<compile_context>
chip_gen: v6e
topology: v6e:2x2x1
jax: 0.10.0
libtpu: 0.0.40
codegen_flags: <defaults>
</compile_context>

<pallas_src>
import functools

import jax
import jax.numpy as jnp
import numpy as np
from jax.experimental import pallas as pl
from jax.experimental.pallas import tpu as pltpu


def _round_up(x, m):
    return (x + m - 1) // m * m


# ----------------------------- fused Pallas kernel -----------------------------

def fused_kernel(a_ref, x_ref, gcn_w_ref, gcn_b_ref,
                 w_ih_ref, w_hh_ref, b_ih_ref, b_hh_ref,
                 w1_ref, b1_ref, w2_ref, b2_ref, w3_ref, b3_ref, w4_ref, b4_ref,
                 out_ref, *, T, B_pad, H_pad):
    f32 = jnp.float32

    # ---- GCN:  A_hat @ (X W) + b   (node rows are in time-major padded layout) ----
    xw = jnp.dot(x_ref[...], gcn_w_ref[...], preferred_element_type=f32)
    gcn = jnp.dot(a_ref[...], xw, preferred_element_type=f32) + gcn_b_ref[...]      # [T*B_pad, H_pad]

    # ---- GRU input projection hoisted out of the recurrence (one big matmul) ----
    gi_all = jnp.dot(gcn, w_ih_ref[...], preferred_element_type=f32) + b_ih_ref[...]  # [T*B_pad, 3*H_pad]

    w_hh = w_hh_ref[...]                                                 # [H_pad, 3*H_pad]
    b_hh = jnp.broadcast_to(b_hh_ref[...], (B_pad, 3 * H_pad))           # hoisted broadcast

    h = jnp.zeros((B_pad, H_pad), f32)
    acc = jnp.zeros((B_pad, H_pad), f32)
    for t in range(T):                       # T is static -> fully unrolled recurrence
        gi = gi_all[t * B_pad:(t + 1) * B_pad, :]        # sublane-aligned static slice
        gh = jnp.dot(h, w_hh, preferred_element_type=f32) + b_hh
        # gate blocks sit at 128-aligned lane offsets (H_pad is a multiple of 128)
        i_r, i_z, i_n = gi[:, :H_pad], gi[:, H_pad:2 * H_pad], gi[:, 2 * H_pad:]
        h_r, h_z, h_n = gh[:, :H_pad], gh[:, H_pad:2 * H_pad], gh[:, 2 * H_pad:]
        r = jax.nn.sigmoid(i_r + h_r)
        z = jax.nn.sigmoid(i_z + h_z)
        n = jnp.tanh(i_n + r * h_n)
        h = (1.0 - z) * n + z * h
        acc = acc + h
    pooled = acc * (1.0 / T)                 # temporal mean pooling   [B_pad, H_pad]

    # ---- MLP head (Dropout = identity in eval) ----
    h1 = jnp.maximum(jnp.dot(pooled, w1_ref[...], preferred_element_type=f32) + b1_ref[...], 0.0)
    h2 = jnp.maximum(jnp.dot(h1, w2_ref[...], preferred_element_type=f32) + b2_ref[...], 0.0)
    h3 = jnp.maximum(jnp.dot(h2, w3_ref[...], preferred_element_type=f32) + b3_ref[...], 0.0)
    out_ref[...] = jnp.dot(h3, w4_ref[...], preferred_element_type=f32) + b4_ref[...]


# ----------------------------- graph preprocessing (static, outside jit) -------

def build_normalized_adjacency(edge_index, num_nodes):
    """Dense PyG-style GCN normalization: D^{-1/2} (A + I) D^{-1/2},
    with A[dst, src] from directed edges and D = in-degree + 1 (matches gcn_norm)."""
    src = edge_index[0]
    dst = edge_index[1]
    adj = jnp.zeros((num_nodes, num_nodes), jnp.float32).at[dst, src].add(1.0)
    adj = adj + jnp.eye(num_nodes, dtype=jnp.float32)     # self loops
    deg = adj.sum(axis=1)
    dinv = jax.lax.rsqrt(jnp.maximum(deg, 1e-12))
    return dinv[:, None] * adj * dinv[None, :]


def prepare_adjacency(edge_index, batch, time_steps):
    """Build + permute + pad A_hat into the kernel's time-major padded node layout.
    The graph is static -> call once and reuse across forward calls."""
    B, T = batch, time_steps
    N = B * T
    B_pad = _round_up(B, 8)
    Nc = T * B_pad
    a_hat = build_normalized_adjacency(edge_index, N)       # node id n = b*T + t (torch order)
    n = jnp.arange(N)
    pos = (n % T) * B_pad + (n // T)                        # -> kernel position t*B_pad + b
    a_pad = jnp.zeros((Nc, Nc), jnp.float32).at[pos[:, None], pos[None, :]].set(a_hat)
    return a_pad


# ----------------------------- forward wrapper ----------------------------------

@functools.partial(jax.jit, static_argnames=("num_keypoints", "hidden_dim"))
def bird_behavior_classifier(keypoints, a_pad, params, *, num_keypoints, hidden_dim):
    B, T, K, _ = keypoints.shape
    assert K == num_keypoints
    H = hidden_dim
    F = K * 2
    B_pad = _round_up(B, 8)
    H_pad = _round_up(H, 128)
    F_pad = _round_up(F, 128)
    Nc = T * B_pad
    OUT_PAD = 128
    assert a_pad.shape == (Nc, Nc), a_pad.shape

    # node features in time-major padded layout: row t*B_pad + b
    x_tbf = keypoints.astype(jnp.float32).reshape(B, T, F).transpose(1, 0, 2)     # [T, B, F] (tiny)
    x_pad = jnp.pad(x_tbf, ((0, 0), (0, B_pad - B), (0, F_pad - F))).reshape(Nc, F_pad)

    def pad2(w, rows, cols):
        w = w.astype(jnp.float32)
        return jnp.pad(w, ((0, rows - w.shape[0]), (0, cols - w.shape[1])))

    def pad_gates(w, rows):
        # [rows_orig, 3H] -> [rows, 3*H_pad]; each gate block starts at a 128-aligned lane
        w = w.astype(jnp.float32)
        gates = [jnp.pad(w[:, g * H:(g + 1) * H],
                         ((0, rows - w.shape[0]), (0, H_pad - H))) for g in range(3)]
        return jnp.concatenate(gates, axis=1)

    gcn_w = pad2(params["gcn_w"], F_pad, H_pad)
    gcn_b = pad2(params["gcn_b"], 1, H_pad)
    w_ih = pad_gates(params["gru_w_ih"], H_pad)
    w_hh = pad_gates(params["gru_w_hh"], H_pad)
    b_ih = pad_gates(params["gru_b_ih"], 1)
    b_hh = pad_gates(params["gru_b_hh"], 1)
    w1 = pad2(params["fc1_w"], H_pad, 128);    b1 = pad2(params["fc1_b"], 1, 128)
    w2 = pad2(params["fc2_w"], 128, 128);      b2 = pad2(params["fc2_b"], 1, 128)
    w3 = pad2(params["fc3_w"], 128, 128);      b3 = pad2(params["fc3_b"], 1, 128)
    w4 = pad2(params["fc4_w"], 128, OUT_PAD);  b4 = pad2(params["fc4_b"], 1, OUT_PAD)

    kernel = functools.partial(fused_kernel, T=T, B_pad=B_pad, H_pad=H_pad)
    out_pad = pl.pallas_call(
        kernel,
        out_shape=jax.ShapeDtypeStruct((B_pad, OUT_PAD), jnp.float32),
        in_specs=[pl.BlockSpec(memory_space=pltpu.MemorySpace.VMEM) for _ in range(16)],
        out_specs=pl.BlockSpec(memory_space=pltpu.MemorySpace.VMEM),
    )(a_pad, x_pad, gcn_w, gcn_b, w_ih, w_hh, b_ih, b_hh,
      w1, b1, w2, b2, w3, b3, w4, b4)

    return out_pad[:B, :1]                      # logits [B, 1]


# ----------------------------- pure-JAX reference (for checking) ----------------

def reference_forward(keypoints, edge_index, params, *, hidden_dim):
    B, T, K, _ = keypoints.shape
    H = hidden_dim
    N = B * T
    x = keypoints.astype(jnp.float32).reshape(N, K * 2)
    a_hat = build_normalized_adjacency(edge_index, N)
    gcn = a_hat @ (x @ params["gcn_w"]) + params["gcn_b"]               # [N, H]
    seq = gcn.reshape(B, T, H)
    h = jnp.zeros((B, H), jnp.float32)
    hs = []
    for t in range(T):
        gi = seq[:, t] @ params["gru_w_ih"] + params["gru_b_ih"]
        gh = h @ params["gru_w_hh"] + params["gru_b_hh"]
        r = jax.nn.sigmoid(gi[:, :H] + gh[:, :H])
        z = jax.nn.sigmoid(gi[:, H:2 * H] + gh[:, H:2 * H])
        n = jnp.tanh(gi[:, 2 * H:] + r * gh[:, 2 * H:])
        h = (1.0 - z) * n + z * h
        hs.append(h)
    pooled = jnp.mean(jnp.stack(hs, axis=1), axis=1)
    h1 = jax.nn.relu(pooled @ params["fc1_w"] + params["fc1_b"])
    h2 = jax.nn.relu(h1 @ params["fc2_w"] + params["fc2_b"])
    h3 = jax.nn.relu(h2 @ params["fc3_w"] + params["fc3_b"])
    return h3 @ params["fc4_w"] + params["fc4_b"]


# ----------------------------- param init ----------------------------------------

def init_params(key, num_keypoints, hidden_dim):
    in_feat = num_keypoints * 2
    H = hidden_dim
    ks = jax.random.split(key, 10)

    def normal(k, shape, scale=0.1):
        return (scale * jax.random.normal(k, shape)).astype(jnp.float32)

    return {
        # GCNConv(in_feat, H): weight stored [in_feat, H], bias [1, H]
        "gcn_w": normal(ks[0], (in_feat, H)),
        "gcn_b": normal(ks[1], (1, H)),
        # GRU(H, H): torch weight_ih_l0 is [3H, H]; stored pre-transposed [H, 3H] (gates r|z|n)
        "gru_w_ih": normal(ks[2], (H, 3 * H)),
        "gru_w_hh": normal(ks[3], (H, 3 * H)),
        "gru_b_ih": normal(ks[4], (1, 3 * H)),
        "gru_b_hh": normal(ks[5], (1, 3 * H)),
        # fc head: Linear weights stored [in, out] (transposed from torch)
        "fc1_w": normal(ks[6], (H, 64)),   "fc1_b": jnp.zeros((1, 64), jnp.float32),
        "fc2_w": normal(ks[7], (64, 32)),  "fc2_b": jnp.zeros((1, 32), jnp.float32),
        "fc3_w": normal(ks[8], (32, 16)),  "fc3_b": jnp.zeros((1, 16), jnp.float32),
        "fc4_w": normal(ks[9], (16, 1)),   "fc4_b": jnp.zeros((1, 1), jnp.float32),
    }


# ----------------------------- main -----------------------------------------------

if __name__ == "__main__":
    B, T, K, H = 2, 8, 4, 32

    key = jax.random.PRNGKey(0)
    k_inp, k_par = jax.random.split(key)
    keypoints = jax.random.normal(k_inp, (B, T, K, 2), dtype=jnp.float32)

    # per-sample bidirectional temporal chain graphs (block-diagonal across the batch)
    src, dst = [], []
    for b in range(B):
        base = b * T
        for t in range(T - 1):
            src += [base + t, base + t + 1]
            dst += [base + t + 1, base + t]
    edge_index = jnp.array([src, dst], dtype=jnp.int32)      # [2, 2*B*(T-1)]

    params = init_params(k_par, num_keypoints=K, hidden_dim=H)

    # static graph -> build / permute / pad the normalized adjacency ONCE, reuse across calls
    a_pad = jax.block_until_ready(prepare_adjacency(edge_index, B, T))

    logits = bird_behavior_classifier(keypoints, a_pad, params, num_keypoints=K, hidden_dim=H)
    logits = jax.block_until_ready(logits)

    assert logits.shape == (B, 1), logits.shape
    assert logits.dtype == jnp.float32

    # correctness check against a pure-JAX reference of the same forward pass
    ref = reference_forward(keypoints, edge_index, params, hidden_dim=H)
    np.testing.assert_allclose(np.asarray(logits), np.asarray(ref), rtol=2e-3, atol=2e-3)

    print("KERNEL_OK")
</pallas_src>

<mosaic_0001>
module attributes {stable_mosaic.version = 11 : i64} {
  func.func @fused_kernel(%arg0: memref<64x64xf32, #tpu.memory_space<vmem>>, %arg1: memref<64x128xf32, #tpu.memory_space<vmem>>, %arg2: memref<128x128xf32, #tpu.memory_space<vmem>>, %arg3: memref<1x128xf32, #tpu.memory_space<vmem>>, %arg4: memref<128x384xf32, #tpu.memory_space<vmem>>, %arg5: memref<128x384xf32, #tpu.memory_space<vmem>>, %arg6: memref<1x384xf32, #tpu.memory_space<vmem>>, %arg7: memref<1x384xf32, #tpu.memory_space<vmem>>, %arg8: memref<128x128xf32, #tpu.memory_space<vmem>>, %arg9: memref<1x128xf32, #tpu.memory_space<vmem>>, %arg10: memref<128x128xf32, #tpu.memory_space<vmem>>, %arg11: memref<1x128xf32, #tpu.memory_space<vmem>>, %arg12: memref<128x128xf32, #tpu.memory_space<vmem>>, %arg13: memref<1x128xf32, #tpu.memory_space<vmem>>, %arg14: memref<128x128xf32, #tpu.memory_space<vmem>>, %arg15: memref<1x128xf32, #tpu.memory_space<vmem>>, %arg16: memref<8x128xf32, #tpu.memory_space<vmem>>) attributes {dimension_semantics = [], scalar_prefetch = 0 : i64, scratch_operands = 0 : i64, tpu.core_type = #tpu.core_type<tc>} {
    %c0 = arith.constant 0 : index
    %c0_0 = arith.constant 0 : index
    %0 = vector.load %arg1[%c0, %c0_0] : memref<64x128xf32, #tpu.memory_space<vmem>>, vector<64x128xf32>
    %c0_1 = arith.constant 0 : index
    %c0_2 = arith.constant 0 : index
    %1 = vector.load %arg2[%c0_1, %c0_2] : memref<128x128xf32, #tpu.memory_space<vmem>>, vector<128x128xf32>
    %cst = arith.constant dense<0.000000e+00> : vector<64x128xf32>
    %2 = tpu.matmul %0, %1, %cst {dimension_numbers = #tpu.dot_dimension_numbers<[1], [0], [0], [1], [0, 0, 1, 1], [], []>} : vector<64x128xf32>, vector<128x128xf32>, vector<64x128xf32> -> vector<64x128xf32>
    %c0_3 = arith.constant 0 : index
    %c0_4 = arith.constant 0 : index
    %3 = vector.load %arg0[%c0_3, %c0_4] : memref<64x64xf32, #tpu.memory_space<vmem>>, vector<64x64xf32>
    %cst_5 = arith.constant dense<0.000000e+00> : vector<64x128xf32>
    %4 = tpu.matmul %3, %2, %cst_5 {dimension_numbers = #tpu.dot_dimension_numbers<[1], [0], [0], [1], [0, 0, 1, 1], [], []>} : vector<64x64xf32>, vector<64x128xf32>, vector<64x128xf32> -> vector<64x128xf32>
    %c0_6 = arith.constant 0 : index
    %c0_7 = arith.constant 0 : index
    %5 = vector.load %arg3[%c0_6, %c0_7] : memref<1x128xf32, #tpu.memory_space<vmem>>, vector<1x128xf32>
    %6 = vector.broadcast %5 : vector<1x128xf32> to vector<64x128xf32>
    %7 = arith.addf %4, %6 : vector<64x128xf32>
    %c0_8 = arith.constant 0 : index
    %c0_9 = arith.constant 0 : index
    %8 = vector.load %arg4[%c0_8, %c0_9] : memref<128x384xf32, #tpu.memory_space<vmem>>, vector<128x384xf32>
    %cst_10 = arith.constant dense<0.000000e+00> : vector<64x384xf32>
    %9 = tpu.matmul %7, %8, %cst_10 {dimension_numbers = #tpu.dot_dimension_numbers<[1], [0], [0], [1], [0, 0, 1, 1], [], []>} : vector<64x128xf32>, vector<128x384xf32>, vector<64x384xf32> -> vector<64x384xf32>
    %c0_11 = arith.constant 0 : index
    %c0_12 = arith.constant 0 : index
    %10 = vector.load %arg6[%c0_11, %c0_12] : memref<1x384xf32, #tpu.memory_space<vmem>>, vector<1x384xf32>
    %11 = vector.broadcast %10 : vector<1x384xf32> to vector<64x384xf32>
    %12 = arith.addf %9, %11 : vector<64x384xf32>
    %c0_13 = arith.constant 0 : index
    %c0_14 = arith.constant 0 : index
    %13 = vector.load %arg5[%c0_13, %c0_14] : memref<128x384xf32, #tpu.memory_space<vmem>>, vector<128x384xf32>
    %c0_15 = arith.constant 0 : index
    %c0_16 = arith.constant 0 : index
    %14 = vector.load %arg7[%c0_15, %c0_16] : memref<1x384xf32, #tpu.memory_space<vmem>>, vector<1x384xf32>
    %15 = vector.shape_cast %14 : vector<1x384xf32> to vector<1x384xf32>
    %16 = vector.broadcast %15 : vector<1x384xf32> to vector<8x384xf32>
    %cst_17 = arith.constant 0.000000e+00 : f32
    %17 = vector.broadcast %cst_17 : f32 to vector<8x128xf32>
    %cst_18 = arith.constant 0.000000e+00 : f32
    %18 = vector.broadcast %cst_18 : f32 to vector<8x128xf32>
    %19 = vector.extract_strided_slice %12 {offsets = [0, 0], sizes = [8, 384], strides = [1, 1]} : vector<64x384xf32> to vector<8x384xf32>
    %cst_19 = arith.constant dense<0.000000e+00> : vector<8x384xf32>
    %20 = tpu.matmul %17, %13, %cst_19 {dimension_numbers = #tpu.dot_dimension_numbers<[1], [0], [0], [1], [0, 0, 1, 1], [], []>} : vector<8x128xf32>, vector<128x384xf32>, vector<8x384xf32> -> vector<8x384xf32>
    %21 = arith.addf %20, %16 : vector<8x384xf32>
    %22 = vector.extract_strided_slice %19 {offsets = [0, 0], sizes = [8, 128], strides = [1, 1]} : vector<8x384xf32> to vector<8x128xf32>
    %23 = vector.extract_strided_slice %19 {offsets = [0, 128], sizes = [8, 128], strides = [1, 1]} : vector<8x384xf32> to vector<8x128xf32>
    %24 = vector.extract_strided_slice %19 {offsets = [0, 256], sizes = [8, 128], strides = [1, 1]} : vector<8x384xf32> to vector<8x128xf32>
    %25 = vector.extract_strided_slice %21 {offsets = [0, 0], sizes = [8, 128], strides = [1, 1]} : vector<8x384xf32> to vector<8x128xf32>
    %26 = vector.extract_strided_slice %21 {offsets = [0, 128], sizes = [8, 128], strides = [1, 1]} : vector<8x384xf32> to vector<8x128xf32>
    %27 = vector.extract_strided_slice %21 {offsets = [0, 256], sizes = [8, 128], strides = [1, 1]} : vector<8x384xf32> to vector<8x128xf32>
    %28 = arith.addf %22, %25 : vector<8x128xf32>
    %29 = arith.negf %28 : vector<8x128xf32>
    %30 = math.exp %29 : vector<8x128xf32>
    %cst_20 = arith.constant 1.000000e+00 : f32
    %31 = vector.broadcast %cst_20 : f32 to vector<8x128xf32>
    %32 = arith.addf %31, %30 : vector<8x128xf32>
    %33 = arith.divf %31, %32 : vector<8x128xf32>
    %34 = arith.addf %23, %26 : vector<8x128xf32>
    %35 = arith.negf %34 : vector<8x128xf32>
    %36 = math.exp %35 : vector<8x128xf32>
    %cst_21 = arith.constant 1.000000e+00 : f32
    %37 = vector.broadcast %cst_21 : f32 to vector<8x128xf32>
    %38 = arith.addf %37, %36 : vector<8x128xf32>
    %39 = arith.divf %37, %38 : vector<8x128xf32>
    %40 = arith.mulf %33, %27 : vector<8x128xf32>
    %41 = arith.addf %24, %40 : vector<8x128xf32>
    %42 = math.tanh %41 : vector<8x128xf32>
    %cst_22 = arith.constant 1.000000e+00 : f32
    %43 = vector.broadcast %cst_22 : f32 to vector<8x128xf32>
    %44 = arith.subf %43, %39 : vector<8x128xf32>
    %45 = arith.mulf %44, %42 : vector<8x128xf32>
    %46 = arith.mulf %39, %17 : vector<8x128xf32>
    %47 = arith.addf %45, %46 : vector<8x128xf32>
    %48 = arith.addf %18, %47 : vector<8x128xf32>
    %49 = vector.extract_strided_slice %12 {offsets = [8, 0], sizes = [8, 384], strides = [1, 1]} : vector<64x384xf32> to vector<8x384xf32>
    %cst_23 = arith.constant dense<0.000000e+00> : vector<8x384xf32>
    %50 = tpu.matmul %47, %13, %cst_23 {dimension_numbers = #tpu.dot_dimension_numbers<[1], [0], [0], [1], [0, 0, 1, 1], [], []>} : vector<8x128xf32>, vector<128x384xf32>, vector<8x384xf32> -> vector<8x384xf32>
    %51 = arith.addf %50, %16 : vector<8x384xf32>
    %52 = vector.extract_strided_slice %49 {offsets = [0, 0], sizes = [8, 128], strides = [1, 1]} : vector<8x384xf32> to vector<8x128xf32>
    %53 = vector.extract_strided_slice %49 {offsets = [0, 128], sizes = [8, 128], strides = [1, 1]} : vector<8x384xf32> to vector<8x128xf32>
    %54 = vector.extract_strided_slice %49 {offsets = [0, 256], sizes = [8, 128], strides = [1, 1]} : vector<8x384xf32> to vector<8x128xf32>
    %55 = vector.extract_strided_slice %51 {offsets = [0, 0], sizes = [8, 128], strides = [1, 1]} : vector<8x384xf32> to vector<8x128xf32>
    %56 = vector.extract_strided_slice %51 {offsets = [0, 128], sizes = [8, 128], strides = [1, 1]} : vector<8x384xf32> to vector<8x128xf32>
    %57 = vector.extract_strided_slice %51 {offsets = [0, 256], sizes = [8, 128], strides = [1, 1]} : vector<8x384xf32> to vector<8x128xf32>
    %58 = arith.addf %52, %55 : vector<8x128xf32>
    %59 = arith.negf %58 : vector<8x128xf32>
    %60 = math.exp %59 : vector<8x128xf32>
    %cst_24 = arith.constant 1.000000e+00 : f32
    %61 = vector.broadcast %cst_24 : f32 to vector<8x128xf32>
    %62 = arith.addf %61, %60 : vector<8x128xf32>
    %63 = arith.divf %61, %62 : vector<8x128xf32>
    %64 = arith.addf %53, %56 : vector<8x128xf32>
    %65 = arith.negf %64 : vector<8x128xf32>
    %66 = math.exp %65 : vector<8x128xf32>
    %cst_25 = arith.constant 1.000000e+00 : f32
    %67 = vector.broadcast %cst_25 : f32 to vector<8x128xf32>
    %68 = arith.addf %67, %66 : vector<8x128xf32>
    %69 = arith.divf %67, %68 : vector<8x128xf32>
    %70 = arith.mulf %63, %57 : vector<8x128xf32>
    %71 = arith.addf %54, %70 : vector<8x128xf32>
    %72 = math.tanh %71 : vector<8x128xf32>
    %cst_26 = arith.constant 1.000000e+00 : f32
    %73 = vector.broadcast %cst_26 : f32 to vector<8x128xf32>
    %74 = arith.subf %73, %69 : vector<8x128xf32>
    %75 = arith.mulf %74, %72 : vector<8x128xf32>
    %76 = arith.mulf %69, %47 : vector<8x128xf32>
    %77 = arith.addf %75, %76 : vector<8x128xf32>
    %78 = arith.addf %48, %77 : vector<8x128xf32>
    %79 = vector.extract_strided_slice %12 {offsets = [16, 0], sizes = [8, 384], strides = [1, 1]} : vector<64x384xf32> to vector<8x384xf32>
    %cst_27 = arith.constant dense<0.000000e+00> : vector<8x384xf32>
    %80 = tpu.matmul %77, %13, %cst_27 {dimension_numbers = #tpu.dot_dimension_numbers<[1], [0], [0], [1], [0, 0, 1, 1], [], []>} : vector<8x128xf32>, vector<128x384xf32>, vector<8x384xf32> -> vector<8x384xf32>
    %81 = arith.addf %80, %16 : vector<8x384xf32>
    %82 = vector.extract_strided_slice %79 {offsets = [0, 0], sizes = [8, 128], strides = [1, 1]} : vector<8x384xf32> to vector<8x128xf32>
    %83 = vector.extract_strided_slice %79 {offsets = [0, 128], sizes = [8, 128], strides = [1, 1]} : vector<8x384xf32> to vector<8x128xf32>
    %84 = vector.extract_strided_slice %79 {offsets = [0, 256], sizes = [8, 128], strides = [1, 1]} : vector<8x384xf32> to vector<8x128xf32>
    %85 = vector.extract_strided_slice %81 {offsets = [0, 0], sizes = [8, 128], strides = [1, 1]} : vector<8x384xf32> to vector<8x128xf32>
    %86 = vector.extract_strided_slice %81 {offsets = [0, 128], sizes = [8, 128], strides = [1, 1]} : vector<8x384xf32> to vector<8x128xf32>
    %87 = vector.extract_strided_slice %81 {offsets = [0, 256], sizes = [8, 128], strides = [1, 1]} : vector<8x384xf32> to vector<8x128xf32>
    %88 = arith.addf %82, %85 : vector<8x128xf32>
    %89 = arith.negf %88 : vector<8x128xf32>
    %90 = math.exp %89 : vector<8x128xf32>
    %cst_28 = arith.constant 1.000000e+00 : f32
    %91 = vector.broadcast %cst_28 : f32 to vector<8x128xf32>
    %92 = arith.addf %91, %90 : vector<8x128xf32>
    %93 = arith.divf %91, %92 : vector<8x128xf32>
    %94 = arith.addf %83, %86 : vector<8x128xf32>
    %95 = arith.negf %94 : vector<8x128xf32>
    %96 = math.exp %95 : vector<8x128xf32>
    %cst_29 = arith.constant 1.000000e+00 : f32
    %97 = vector.broadcast %cst_29 : f32 to vector<8x128xf32>
    %98 = arith.addf %97, %96 : vector<8x128xf32>
    %99 = arith.divf %97, %98 : vector<8x128xf32>
    %100 = arith.mulf %93, %87 : vector<8x128xf32>
    %101 = arith.addf %84, %100 : vector<8x128xf32>
    %102 = math.tanh %101 : vector<8x128xf32>
    %cst_30 = arith.constant 1.000000e+00 : f32
    %103 = vector.broadcast %cst_30 : f32 to vector<8x128xf32>
    %104 = arith.subf %103, %99 : vector<8x128xf32>
    %105 = arith.mulf %104, %102 : vector<8x128xf32>
    %106 = arith.mulf %99, %77 : vector<8x128xf32>
    %107 = arith.addf %105, %106 : vector<8x128xf32>
    %108 = arith.addf %78, %107 : vector<8x128xf32>
    %109 = vector.extract_strided_slice %12 {offsets = [24, 0], sizes = [8, 384], strides = [1, 1]} : vector<64x384xf32> to vector<8x384xf32>
    %cst_31 = arith.constant dense<0.000000e+00> : vector<8x384xf32>
    %110 = tpu.matmul %107, %13, %cst_31 {dimension_numbers = #tpu.dot_dimension_numbers<[1], [0], [0], [1], [0, 0, 1, 1], [], []>} : vector<8x128xf32>, vector<128x384xf32>, vector<8x384xf32> -> vector<8x384xf32>
    %111 = arith.addf %110, %16 : vector<8x384xf32>
    %112 = vector.extract_strided_slice %109 {offsets = [0, 0], sizes = [8, 128], strides = [1, 1]} : vector<8x384xf32> to vector<8x128xf32>
    %113 = vector.extract_strided_slice %109 {offsets = [0, 128], sizes = [8, 128], strides = [1, 1]} : vector<8x384xf32> to vector<8x128xf32>
    %114 = vector.extract_strided_slice %109 {offsets = [0, 256], sizes = [8, 128], strides = [1, 1]} : vector<8x384xf32> to vector<8x128xf32>
    %115 = vector.extract_strided_slice %111 {offsets = [0, 0], sizes = [8, 128], strides = [1, 1]} : vector<8x384xf32> to vector<8x128xf32>
    %116 = vector.extract_strided_slice %111 {offsets = [0, 128], sizes = [8, 128], strides = [1, 1]} : vector<8x384xf32> to vector<8x128xf32>
    %117 = vector.extract_strided_slice %111 {offsets = [0, 256], sizes = [8, 128], strides = [1, 1]} : vector<8x384xf32> to vector<8x128xf32>
    %118 = arith.addf %112, %115 : vector<8x128xf32>
    %119 = arith.negf %118 : vector<8x128xf32>
    %120 = math.exp %119 : vector<8x128xf32>
    %cst_32 = arith.constant 1.000000e+00 : f32
    %121 = vector.broadcast %cst_32 : f32 to vector<8x128xf32>
    %122 = arith.addf %121, %120 : vector<8x128xf32>
    %123 = arith.divf %121, %122 : vector<8x128xf32>
    %124 = arith.addf %113, %116 : vector<8x128xf32>
    %125 = arith.negf %124 : vector<8x128xf32>
    %126 = math.exp %125 : vector<8x128xf32>
    %cst_33 = arith.constant 1.000000e+00 : f32
    %127 = vector.broadcast %cst_33 : f32 to vector<8x128xf32>
    %128 = arith.addf %127, %126 : vector<8x128xf32>
    %129 = arith.divf %127, %128 : vector<8x128xf32>
    %130 = arith.mulf %123, %117 : vector<8x128xf32>
    %131 = arith.addf %114, %130 : vector<8x128xf32>
    %132 = math.tanh %131 : vector<8x128xf32>
    %cst_34 = arith.constant 1.000000e+00 : f32
    %133 = vector.broadcast %cst_34 : f32 to vector<8x128xf32>
    %134 = arith.subf %133, %129 : vector<8x128xf32>
    %135 = arith.mulf %134, %132 : vector<8x128xf32>
    %136 = arith.mulf %129, %107 : vector<8x128xf32>
    %137 = arith.addf %135, %136 : vector<8x128xf32>
    %138 = arith.addf %108, %137 : vector<8x128xf32>
    %139 = vector.extract_strided_slice %12 {offsets = [32, 0], sizes = [8, 384], strides = [1, 1]} : vector<64x384xf32> to vector<8x384xf32>
    %cst_35 = arith.constant dense<0.000000e+00> : vector<8x384xf32>
    %140 = tpu.matmul %137, %13, %cst_35 {dimension_numbers = #tpu.dot_dimension_numbers<[1], [0], [0], [1], [0, 0, 1, 1], [], []>} : vector<8x128xf32>, vector<128x384xf32>, vector<8x384xf32> -> vector<8x384xf32>
    %141 = arith.addf %140, %16 : vector<8x384xf32>
    %142 = vector.extract_strided_slice %139 {offsets = [0, 0], sizes = [8, 128], strides = [1, 1]} : vector<8x384xf32> to vector<8x128xf32>
    %143 = vector.extract_strided_slice %139 {offsets = [0, 128], sizes = [8, 128], strides = [1, 1]} : vector<8x384xf32> to vector<8x128xf32>
    %144 = vector.extract_strided_slice %139 {offsets = [0, 256], sizes = [8, 128], strides = [1, 1]} : vector<8x384xf32> to vector<8x128xf32>
    %145 = vector.extract_strided_slice %141 {offsets = [0, 0], sizes = [8, 128], strides = [1, 1]} : vector<8x384xf32> to vector<8x128xf32>
    %146 = vector.extract_strided_slice %141 {offsets = [0, 128], sizes = [8, 128], strides = [1, 1]} : vector<8x384xf32> to vector<8x128xf32>
    %147 = vector.extract_strided_slice %141 {offsets = [0, 256], sizes = [8, 128], strides = [1, 1]} : vector<8x384xf32> to vector<8x128xf32>
    %148 = arith.addf %142, %145 : vector<8x128xf32>
    %149 = arith.negf %148 : vector<8x128xf32>
    %150 = math.exp %149 : vector<8x128xf32>
    %cst_36 = arith.constant 1.000000e+00 : f32
    %151 = vector.broadcast %cst_36 : f32 to vector<8x128xf32>
    %152 = arith.addf %151, %150 : vector<8x128xf32>
    %153 = arith.divf %151, %152 : vector<8x128xf32>
    %154 = arith.addf %143, %146 : vector<8x128xf32>
    %155 = arith.negf %154 : vector<8x128xf32>
    %156 = math.exp %155 : vector<8x128xf32>
    %cst_37 = arith.constant 1.000000e+00 : f32
    %157 = vector.broadcast %cst_37 : f32 to vector<8x128xf32>
    %158 = arith.addf %157, %156 : vector<8x128xf32>
    %159 = arith.divf %157, %158 : vector<8x128xf32>
    %160 = arith.mulf %153, %147 : vector<8x128xf32>
    %161 = arith.addf %144, %160 : vector<8x128xf32>
    %162 = math.tanh %161 : vector<8x128xf32>
    %cst_38 = arith.constant 1.000000e+00 : f32
    %163 = vector.broadcast %cst_38 : f32 to vector<8x128xf32>
    %164 = arith.subf %163, %159 : vector<8x128xf32>
    %165 = arith.mulf %164, %162 : vector<8x128xf32>
    %166 = arith.mulf %159, %137 : vector<8x128xf32>
    %167 = arith.addf %165, %166 : vector<8x128xf32>
    %168 = arith.addf %138, %167 : vector<8x128xf32>
    %169 = vector.extract_strided_slice %12 {offsets = [40, 0], sizes = [8, 384], strides = [1, 1]} : vector<64x384xf32> to vector<8x384xf32>
    %cst_39 = arith.constant dense<0.000000e+00> : vector<8x384xf32>
    %170 = tpu.matmul %167, %13, %cst_39 {dimension_numbers = #tpu.dot_dimension_numbers<[1], [0], [0], [1], [0, 0, 1, 1], [], []>} : vector<8x128xf32>, vector<128x384xf32>, vector<8x384xf32> -> vector<8x384xf32>
    %171 = arith.addf %170, %16 : vector<8x384xf32>
    %172 = vector.extract_strided_slice %169 {offsets = [0, 0], sizes = [8, 128], strides = [1, 1]} : vector<8x384xf32> to vector<8x128xf32>
    %173 = vector.extract_strided_slice %169 {offsets = [0, 128], sizes = [8, 128], strides = [1, 1]} : vector<8x384xf32> to vector<8x128xf32>
    %174 = vector.extract_strided_slice %169 {offsets = [0, 256], sizes = [8, 128], strides = [1, 1]} : vector<8x384xf32> to vector<8x128xf32>
    %175 = vector.extract_strided_slice %171 {offsets = [0, 0], sizes = [8, 128], strides = [1, 1]} : vector<8x384xf32> to vector<8x128xf32>
    %176 = vector.extract_strided_slice %171 {offsets = [0, 128], sizes = [8, 128], strides = [1, 1]} : vector<8x384xf32> to vector<8x128xf32>
    %177 = vector.extract_strided_slice %171 {offsets = [0, 256], sizes = [8, 128], strides = [1, 1]} : vector<8x384xf32> to vector<8x128xf32>
    %178 = arith.addf %172, %175 : vector<8x128xf32>
    %179 = arith.negf %178 : vector<8x128xf32>
    %180 = math.exp %179 : vector<8x128xf32>
    %cst_40 = arith.constant 1.000000e+00 : f32
    %181 = vector.broadcast %cst_40 : f32 to vector<8x128xf32>
    %182 = arith.addf %181, %180 : vector<8x128xf32>
    %183 = arith.divf %181, %182 : vector<8x128xf32>
    %184 = arith.addf %173, %176 : vector<8x128xf32>
    %185 = arith.negf %184 : vector<8x128xf32>
    %186 = math.exp %185 : vector<8x128xf32>
    %cst_41 = arith.constant 1.000000e+00 : f32
    %187 = vector.broadcast %cst_41 : f32 to vector<8x128xf32>
    %188 = arith.addf %187, %186 : vector<8x128xf32>
    %189 = arith.divf %187, %188 : vector<8x128xf32>
    %190 = arith.mulf %183, %177 : vector<8x128xf32>
    %191 = arith.addf %174, %190 : vector<8x128xf32>
    %192 = math.tanh %191 : vector<8x128xf32>
    %cst_42 = arith.constant 1.000000e+00 : f32
    %193 = vector.broadcast %cst_42 : f32 to vector<8x128xf32>
    %194 = arith.subf %193, %189 : vector<8x128xf32>
    %195 = arith.mulf %194, %192 : vector<8x128xf32>
    %196 = arith.mulf %189, %167 : vector<8x128xf32>
    %197 = arith.addf %195, %196 : vector<8x128xf32>
    %198 = arith.addf %168, %197 : vector<8x128xf32>
    %199 = vector.extract_strided_slice %12 {offsets = [48, 0], sizes = [8, 384], strides = [1, 1]} : vector<64x384xf32> to vector<8x384xf32>
    %cst_43 = arith.constant dense<0.000000e+00> : vector<8x384xf32>
    %200 = tpu.matmul %197, %13, %cst_43 {dimension_numbers = #tpu.dot_dimension_numbers<[1], [0], [0], [1], [0, 0, 1, 1], [], []>} : vector<8x128xf32>, vector<128x384xf32>, vector<8x384xf32> -> vector<8x384xf32>
    %201 = arith.addf %200, %16 : vector<8x384xf32>
    %202 = vector.extract_strided_slice %199 {offsets = [0, 0], sizes = [8, 128], strides = [1, 1]} : vector<8x384xf32> to vector<8x128xf32>
    %203 = vector.extract_strided_slice %199 {offsets = [0, 128], sizes = [8, 128], strides = [1, 1]} : vector<8x384xf32> to vector<8x128xf32>
    %204 = vector.extract_strided_slice %199 {offsets = [0, 256], sizes = [8, 128], strides = [1, 1]} : vector<8x384xf32> to vector<8x128xf32>
    %205 = vector.extract_strided_slice %201 {offsets = [0, 0], sizes = [8, 128], strides = [1, 1]} : vector<8x384xf32> to vector<8x128xf32>
    %206 = vector.extract_strided_slice %201 {offsets = [0, 128], sizes = [8, 128], strides = [1, 1]} : vector<8x384xf32> to vector<8x128xf32>
    %207 = vector.extract_strided_slice %201 {offsets = [0, 256], sizes = [8, 128], strides = [1, 1]} : vector<8x384xf32> to vector<8x128xf32>
    %208 = arith.addf %202, %205 : vector<8x128xf32>
    %209 = arith.negf %208 : vector<8x128xf32>
    %210 = math.exp %209 : vector<8x128xf32>
    %cst_44 = arith.constant 1.000000e+00 : f32
    %211 = vector.broadcast %cst_44 : f32 to vector<8x128xf32>
    %212 = arith.addf %211, %210 : vector<8x128xf32>
    %213 = arith.divf %211, %212 : vector<8x128xf32>
    %214 = arith.addf %203, %206 : vector<8x128xf32>
    %215 = arith.negf %214 : vector<8x128xf32>
    %216 = math.exp %215 : vector<8x128xf32>
    %cst_45 = arith.constant 1.000000e+00 : f32
    %217 = vector.broadcast %cst_45 : f32 to vector<8x128xf32>
    %218 = arith.addf %217, %216 : vector<8x128xf32>
    %219 = arith.divf %217, %218 : vector<8x128xf32>
    %220 = arith.mulf %213, %207 : vector<8x128xf32>
    %221 = arith.addf %204, %220 : vector<8x128xf32>
    %222 = math.tanh %221 : vector<8x128xf32>
    %cst_46 = arith.constant 1.000000e+00 : f32
    %223 = vector.broadcast %cst_46 : f32 to vector<8x128xf32>
    %224 = arith.subf %223, %219 : vector<8x128xf32>
    %225 = arith.mulf %224, %222 : vector<8x128xf32>
    %226 = arith.mulf %219, %197 : vector<8x128xf32>
    %227 = arith.addf %225, %226 : vector<8x128xf32>
    %228 = arith.addf %198, %227 : vector<8x128xf32>
    %229 = vector.extract_strided_slice %12 {offsets = [56, 0], sizes = [8, 384], strides = [1, 1]} : vector<64x384xf32> to vector<8x384xf32>
    %cst_47 = arith.constant dense<0.000000e+00> : vector<8x384xf32>
    %230 = tpu.matmul %227, %13, %cst_47 {dimension_numbers = #tpu.dot_dimension_numbers<[1], [0], [0], [1], [0, 0, 1, 1], [], []>} : vector<8x128xf32>, vector<128x384xf32>, vector<8x384xf32> -> vector<8x384xf32>
    %231 = arith.addf %230, %16 : vector<8x384xf32>
    %232 = vector.extract_strided_slice %229 {offsets = [0, 0], sizes = [8, 128], strides = [1, 1]} : vector<8x384xf32> to vector<8x128xf32>
    %233 = vector.extract_strided_slice %229 {offsets = [0, 128], sizes = [8, 128], strides = [1, 1]} : vector<8x384xf32> to vector<8x128xf32>
    %234 = vector.extract_strided_slice %229 {offsets = [0, 256], sizes = [8, 128], strides = [1, 1]} : vector<8x384xf32> to vector<8x128xf32>
    %235 = vector.extract_strided_slice %231 {offsets = [0, 0], sizes = [8, 128], strides = [1, 1]} : vector<8x384xf32> to vector<8x128xf32>
    %236 = vector.extract_strided_slice %231 {offsets = [0, 128], sizes = [8, 128], strides = [1, 1]} : vector<8x384xf32> to vector<8x128xf32>
    %237 = vector.extract_strided_slice %231 {offsets = [0, 256], sizes = [8, 128], strides = [1, 1]} : vector<8x384xf32> to vector<8x128xf32>
    %238 = arith.addf %232, %235 : vector<8x128xf32>
    %239 = arith.negf %238 : vector<8x128xf32>
    %240 = math.exp %239 : vector<8x128xf32>
    %cst_48 = arith.constant 1.000000e+00 : f32
    %241 = vector.broadcast %cst_48 : f32 to vector<8x128xf32>
    %242 = arith.addf %241, %240 : vector<8x128xf32>
    %243 = arith.divf %241, %242 : vector<8x128xf32>
    %244 = arith.addf %233, %236 : vector<8x128xf32>
    %245 = arith.negf %244 : vector<8x128xf32>
    %246 = math.exp %245 : vector<8x128xf32>
    %cst_49 = arith.constant 1.000000e+00 : f32
    %247 = vector.broadcast %cst_49 : f32 to vector<8x128xf32>
    %248 = arith.addf %247, %246 : vector<8x128xf32>
    %249 = arith.divf %247, %248 : vector<8x128xf32>
    %250 = arith.mulf %243, %237 : vector<8x128xf32>
    %251 = arith.addf %234, %250 : vector<8x128xf32>
    %252 = math.tanh %251 : vector<8x128xf32>
    %cst_50 = arith.constant 1.000000e+00 : f32
    %253 = vector.broadcast %cst_50 : f32 to vector<8x128xf32>
    %254 = arith.subf %253, %249 : vector<8x128xf32>
    %255 = arith.mulf %254, %252 : vector<8x128xf32>
    %256 = arith.mulf %249, %227 : vector<8x128xf32>
    %257 = arith.addf %255, %256 : vector<8x128xf32>
    %258 = arith.addf %228, %257 : vector<8x128xf32>
    %cst_51 = arith.constant 1.250000e-01 : f32
    %259 = vector.broadcast %cst_51 : f32 to vector<8x128xf32>
    %260 = arith.mulf %258, %259 : vector<8x128xf32>
    %c0_52 = arith.constant 0 : index
    %c0_53 = arith.constant 0 : index
    %261 = vector.load %arg8[%c0_52, %c0_53] : memref<128x128xf32, #tpu.memory_space<vmem>>, vector<128x128xf32>
    %cst_54 = arith.constant dense<0.000000e+00> : vector<8x128xf32>
    %262 = tpu.matmul %260, %261, %cst_54 {dimension_numbers = #tpu.dot_dimension_numbers<[1], [0], [0], [1], [0, 0, 1, 1], [], []>} : vector<8x128xf32>, vector<128x128xf32>, vector<8x128xf32> -> vector<8x128xf32>
    %c0_55 = arith.constant 0 : index
    %c0_56 = arith.constant 0 : index
    %263 = vector.load %arg9[%c0_55, %c0_56] : memref<1x128xf32, #tpu.memory_space<vmem>>, vector<1x128xf32>
    %264 = vector.broadcast %263 : vector<1x128xf32> to vector<8x128xf32>
    %265 = arith.addf %262, %264 : vector<8x128xf32>
    %cst_57 = arith.constant 0.000000e+00 : f32
    %266 = vector.broadcast %cst_57 : f32 to vector<8x128xf32>
    %267 = arith.maximumf %265, %266 : vector<8x128xf32>
    %c0_58 = arith.constant 0 : index
    %c0_59 = arith.constant 0 : index
    %268 = vector.load %arg10[%c0_58, %c0_59] : memref<128x128xf32, #tpu.memory_space<vmem>>, vector<128x128xf32>
    %cst_60 = arith.constant dense<0.000000e+00> : vector<8x128xf32>
    %269 = tpu.matmul %267, %268, %cst_60 {dimension_numbers = #tpu.dot_dimension_numbers<[1], [0], [0], [1], [0, 0, 1, 1], [], []>} : vector<8x128xf32>, vector<128x128xf32>, vector<8x128xf32> -> vector<8x128xf32>
    %c0_61 = arith.constant 0 : index
    %c0_62 = arith.constant 0 : index
    %270 = vector.load %arg11[%c0_61, %c0_62] : memref<1x128xf32, #tpu.memory_space<vmem>>, vector<1x128xf32>
    %271 = vector.broadcast %270 : vector<1x128xf32> to vector<8x128xf32>
    %272 = arith.addf %269, %271 : vector<8x128xf32>
    %cst_63 = arith.constant 0.000000e+00 : f32
    %273 = vector.broadcast %cst_63 : f32 to vector<8x128xf32>
    %274 = arith.maximumf %272, %273 : vector<8x128xf32>
    %c0_64 = arith.constant 0 : index
    %c0_65 = arith.constant 0 : index
    %275 = vector.load %arg12[%c0_64, %c0_65] : memref<128x128xf32, #tpu.memory_space<vmem>>, vector<128x128xf32>
    %cst_66 = arith.constant dense<0.000000e+00> : vector<8x128xf32>
    %276 = tpu.matmul %274, %275, %cst_66 {dimension_numbers = #tpu.dot_dimension_numbers<[1], [0], [0], [1], [0, 0, 1, 1], [], []>} : vector<8x128xf32>, vector<128x128xf32>, vector<8x128xf32> -> vector<8x128xf32>
    %c0_67 = arith.constant 0 : index
    %c0_68 = arith.constant 0 : index
    %277 = vector.load %arg13[%c0_67, %c0_68] : memref<1x128xf32, #tpu.memory_space<vmem>>, vector<1x128xf32>
    %278 = vector.broadcast %277 : vector<1x128xf32> to vector<8x128xf32>
    %279 = arith.addf %276, %278 : vector<8x128xf32>
    %cst_69 = arith.constant 0.000000e+00 : f32
    %280 = vector.broadcast %cst_69 : f32 to vector<8x128xf32>
    %281 = arith.maximumf %279, %280 : vector<8x128xf32>
    %c0_70 = arith.constant 0 : index
    %c0_71 = arith.constant 0 : index
    %282 = vector.load %arg14[%c0_70, %c0_71] : memref<128x128xf32, #tpu.memory_space<vmem>>, vector<128x128xf32>
    %cst_72 = arith.constant dense<0.000000e+00> : vector<8x128xf32>
    %283 = tpu.matmul %281, %282, %cst_72 {dimension_numbers = #tpu.dot_dimension_numbers<[1], [0], [0], [1], [0, 0, 1, 1], [], []>} : vector<8x128xf32>, vector<128x128xf32>, vector<8x128xf32> -> vector<8x128xf32>
    %c0_73 = arith.constant 0 : index
    %c0_74 = arith.constant 0 : index
    %284 = vector.load %arg15[%c0_73, %c0_74] : memref<1x128xf32, #tpu.memory_space<vmem>>, vector<1x128xf32>
    %285 = vector.broadcast %284 : vector<1x128xf32> to vector<8x128xf32>
    %286 = arith.addf %283, %285 : vector<8x128xf32>
    %c0_75 = arith.constant 0 : index
    %c0_76 = arith.constant 0 : index
    %287 = vector.load %arg16[%c0_75, %c0_76] : memref<8x128xf32, #tpu.memory_space<vmem>>, vector<8x128xf32>
    tpu.vector_store %arg16[%c0_75, %c0_76], %286 {strides = array<i32>} : memref<8x128xf32, #tpu.memory_space<vmem>>, vector<8x128xf32>,
    return
  }
}

</mosaic_0001>

<bundles_post_ra>
// kernel: bird_behavior_classifier.1
= control target key start
LH: loop header
LB: loop body
LE: loop exit
PB: predicated region body
PF: predicated region fallthrough
CT: control target
= control target key end

     0   :  { %vm197_vm0 = vcmask 523264   ;;  %vm3324_vm1 = vmmov 0   ;;  %s5129_s2 = inlined_call_operand.vmem [shape: f32[128,128], index: 2, kind: input, shape index: {}]   ;;  %s5130_s1 = inlined_call_operand.vmem [shape: f32[64,128], index: 1, kind: input, shape index: {}]   ;;  %s5131_s0 = inlined_call_operand.vmem [shape: f32[64,64], index: 0, kind: input, shape index: {}]   ;;  %s5132_s4 = inlined_call_operand.vmem [shape: f32[128,384], index: 4, kind: input, shape index: {}]   ;;  %s5133_s5 = inlined_call_operand.vmem [shape: f32[128,384], index: 5, kind: input, shape index: {}]   ;;  %s5134_s3 = inlined_call_operand.vmem [shape: f32[1,128], index: 3, kind: input, shape index: {}]   ;;  %s5135_s6 = inlined_call_operand.vmem [shape: f32[1,384], index: 6, kind: input, shape index: {}]   ;;  %s5136_s7 = inlined_call_operand.vmem [shape: f32[1,384], index: 7, kind: input, shape index: {}]   ;;  %s5137_s8 = inlined_call_operand.vmem [shape: f32[128,128], index: 8, kind: input, shape index: {}]   ;;  %s5138_s10 = inlined_call_operand.vmem [shape: f32[128,128], index: 10, kind: input, shape index: {}]   ;;  %s5139_s12 = inlined_call_operand.vmem [shape: f32[128,128], index: 12, kind: input, shape index: {}]   ;;  %s5140_s9 = inlined_call_operand.vmem [shape: f32[1,128], index: 9, kind: input, shape index: {}]   ;;  %s5141_s14 = inlined_call_operand.vmem [shape: f32[128,128], index: 14, kind: input, shape index: {}]   ;;  %s5142_s11 = inlined_call_operand.vmem [shape: f32[1,128], index: 11, kind: input, shape index: {}]   ;;  %s5143_s13 = inlined_call_operand.vmem [shape: f32[1,128], index: 13, kind: input, shape index: {}]   ;;  %s5144_s15 = inlined_call_operand.vmem [shape: f32[1,128], index: 15, kind: input, shape index: {}]   ;;  %s5145_s16 = inlined_call_operand.vmem [shape: f32[8,128], index: 16, kind: output, shape index: {}]  }
   0x1   :  { %5180 = sst [smem:[#allocation34_spill]] %s5129_s2  ;;  %v53_v4 = vld [vmem:[%s5130_s1] sm:$0xff]  ;;  %v54_v17 = vld [vmem:[%s5130_s1 + $0x8] sm:$0xff]  ;;  %v55_v18 = vld [vmem:[%s5130_s1 + $0x10] sm:$0xff] }
   0x2   :  { %s5181_s23 = sld [smem:[#allocation34_spill]]  ;;  %2689 = vmatprep.mubr.f32.mxu0 %v53_v4  ;;  %v56_v19 = vld [vmem:[%s5130_s1 + $0x18] sm:$0xff]  ;;  %v57_v20 = vld [vmem:[%s5130_s1 + $0x20] sm:$0xff]  ;;  %v58_v21 = vld [vmem:[%s5130_s1 + $0x28] sm:$0xff] }
   0x3   :  { %v59_v22 = vld [vmem:[%s5130_s1 + $0x30] sm:$0xff]  ;;  %v60_v23 = vld [vmem:[%s5130_s1 + $0x38] sm:$0xff]  ;;  %v182_v24 = vld [vmem:[%s5131_s0] sm:$0xff] }
   0x4   :  { %2717 = vmatprep.mubr.msk.f32.mxu1 %vm197_vm0, %v182_v24  ;;  %v374_v25 = vld [vmem:[%s5132_s4 + $0x178] sm:$0xff]  ;;  %v371_v26 = vld [vmem:[%s5132_s4 + $0x160] sm:$0xff]  ;;  %v368_v27 = vld [vmem:[%s5132_s4 + $0x148] sm:$0xff]  ;;  %v5147_v24 = vmov 0.0  }
   0x5   :  { %v365_v28 = vld [vmem:[%s5132_s4 + $0x130] sm:$0xff]  ;;  %v362_v29 = vld [vmem:[%s5132_s4 + $0x118] sm:$0xff]  ;;  %v359_v30 = vld [vmem:[%s5132_s4 + $0x100] sm:$0xff] }
   0x6   :  { %v356_v31 = vld [vmem:[%s5132_s4 + $0xe8] sm:$0xff]  ;;  %v353_v32 = vld [vmem:[%s5132_s4 + $0xd0] sm:$0xff]  ;;  %v350_v33 = vld [vmem:[%s5132_s4 + $0xb8] sm:$0xff] }
   0x7   :  { %v347_v34 = vld [vmem:[%s5132_s4 + $0xa0] sm:$0xff]  ;;  %v344_v35 = vld [vmem:[%s5132_s4 + $0x88] sm:$0xff]  ;;  %v341_v36 = vld [vmem:[%s5132_s4 + $0x70] sm:$0xff] }
   0x8   :  { %v76_v0 = vld [vmem:[%s5181_s23 + $0x78] sm:$0xff]  ;;  %v75_v1 = vld [vmem:[%s5181_s23 + $0x70] sm:$0xff]  ;;  %v74_v2 = vld [vmem:[%s5181_s23 + $0x68] sm:$0xff] }
   0x9   :  { %2657 = vmatprep.subr.mxu0 %v76_v0  ;;  %v73_v3 = vld [vmem:[%s5181_s23 + $0x60] sm:$0xff]  ;;  %v72_v5 = vld [vmem:[%s5181_s23 + $0x58] sm:$0xff]  ;;  %v71_v6 = vld [vmem:[%s5181_s23 + $0x50] sm:$0xff] }
   0xa   :  { %2658 = vmatpush3.msra.mxu0 %v76_v0  ;;  %v70_v7 = vld [vmem:[%s5181_s23 + $0x48] sm:$0xff]  ;;  %v69_v8 = vld [vmem:[%s5181_s23 + $0x40] sm:$0xff]  ;;  %v68_v9 = vld [vmem:[%s5181_s23 + $0x38] sm:$0xff] }
   0xb   :  { %2659 = vmatprep.subr.mxu0 %v75_v1  ;;  %v67_v10 = vld [vmem:[%s5181_s23 + $0x30] sm:$0xff]  ;;  %v66_v11 = vld [vmem:[%s5181_s23 + $0x28] sm:$0xff]  ;;  %v65_v12 = vld [vmem:[%s5181_s23 + $0x20] sm:$0xff] }
   0xc   :  { %2660 = vmatpush3.msra.mxu0 %v75_v1  ;;  %v64_v13 = vld [vmem:[%s5181_s23 + $0x18] sm:$0xff]  ;;  %v63_v14 = vld [vmem:[%s5181_s23 + $0x10] sm:$0xff]  ;;  %v62_v15 = vld [vmem:[%s5181_s23 + $0x8] sm:$0xff] }
   0xd   :  { %2661 = vmatprep.subr.mxu0 %v74_v2  ;;  %v61_v16 = vld [vmem:[%s5181_s23] sm:$0xff]  ;;  %v338_v37 = vld [vmem:[%s5132_s4 + $0x58] sm:$0xff]  ;;  %v183_v46 = vld [vmem:[%s5131_s0 + $0x8] sm:$0xff] }
   0xe   :  { %2662 = vmatpush3.msra.mxu0 %v74_v2  ;;  %v373_v47 = vld [vmem:[%s5132_s4 + $0x170] sm:$0xff]  ;;  %v372_v49 = vld [vmem:[%s5132_s4 + $0x168] sm:$0xff]  ;;  %v370_v50 = vld [vmem:[%s5132_s4 + $0x158] sm:$0xff] }
   0xf   :  { %2663 = vmatprep.subr.mxu0 %v73_v3  ;;  %v184_v48 = vld [vmem:[%s5131_s0 + $0x10] sm:$0xff]  ;;  %v185_v52 = vld [vmem:[%s5131_s0 + $0x18] sm:$0xff]  ;;  %v367_v53 = vld [vmem:[%s5132_s4 + $0x140] sm:$0xff] }
  0x10   :  { %2664 = vmatpush3.msra.mxu0 %v73_v3  ;;  %v369_v51 = vld [vmem:[%s5132_s4 + $0x150] sm:$0xff]  ;;  %v186_v54 = vld [vmem:[%s5131_s0 + $0x20] sm:$0xff]  ;;  %v366_v55 = vld [vmem:[%s5132_s4 + $0x138] sm:$0xff] }
  0x11   :  { %2665 = vmatprep.subr.mxu0 %v72_v5  ;;  %v364_v56 = vld [vmem:[%s5132_s4 + $0x128] sm:$0xff]  ;;  %v363_v57 = vld [vmem:[%s5132_s4 + $0x120] sm:$0xff]  ;;  %v361_v59 = vld [vmem:[%s5132_s4 + $0x110] sm:$0xff] }
  0x12   :  { %2666 = vmatpush3.msra.mxu0 %v72_v5  ;;  %v187_v58 = vld [vmem:[%s5131_s0 + $0x28] sm:$0xff]  ;;  %v188_v60 = vld [vmem:[%s5131_s0 + $0x30] sm:$0xff]  ;;  %v358_v62 = vld [vmem:[%s5132_s4 + $0xf8] sm:$0xff] }
  0x13   :  { %2667 = vmatprep.subr.mxu0 %v71_v6  ;;  %v360_v61 = vld [vmem:[%s5132_s4 + $0x108] sm:$0xff]  ;;  %v357_v63 = vld [vmem:[%s5132_s4 + $0xf0] sm:$0xff]  ;;  %v189_v0 = vld [vmem:[%s5131_s0 + $0x38] sm:$0xff] }
  0x14   :  { %2668 = vmatpush3.msra.mxu0 %v71_v6  ;;  %v355_v1 = vld [vmem:[%s5132_s4 + $0xe0] sm:$0xff]  ;;  %v354_v2 = vld [vmem:[%s5132_s4 + $0xd8] sm:$0xff]  ;;  %v352_v3 = vld [vmem:[%s5132_s4 + $0xc8] sm:$0xff] }
  0x15   :  { %2669 = vmatprep.subr.mxu0 %v70_v7  ;;  %v351_v4 = vld [vmem:[%s5132_s4 + $0xc0] sm:$0xff]  ;;  %v349_v5 = vld [vmem:[%s5132_s4 + $0xb0] sm:$0xff]  ;;  %v348_v6 = vld [vmem:[%s5132_s4 + $0xa8] sm:$0xff] }
  0x16   :  { %2670 = vmatpush3.msra.mxu0 %v70_v7  ;;  %v346_v7 = vld [vmem:[%s5132_s4 + $0x98] sm:$0xff] }
  0x17   :  { %2671 = vmatprep.subr.mxu0 %v69_v8 }
  0x18   :  { %2672 = vmatpush3.msra.mxu0 %v69_v8  ;;  %v345_v8 = vld [vmem:[%s5132_s4 + $0x90] sm:$0xff] }
  0x19   :  { %2673 = vmatprep.subr.mxu0 %v68_v9 }
  0x1a   :  { %2674 = vmatpush3.msra.mxu0 %v68_v9  ;;  %v343_v9 = vld [vmem:[%s5132_s4 + $0x80] sm:$0xff] }
  0x1b   :  { %2675 = vmatprep.subr.mxu0 %v67_v10 }
  0x1c   :  { %2676 = vmatpush3.msra.mxu0 %v67_v10  ;;  %v342_v10 = vld [vmem:[%s5132_s4 + $0x78] sm:$0xff] }
  0x1d   :  { %2677 = vmatprep.subr.mxu0 %v66_v11 }
  0x1e   :  { %2678 = vmatpush3.msra.mxu0 %v66_v11  ;;  %v340_v11 = vld [vmem:[%s5132_s4 + $0x68] sm:$0xff] }
  0x1f   :  { %2679 = vmatprep.subr.mxu0 %v65_v12 }
  0x20   :  { %2680 = vmatpush3.msra.mxu0 %v65_v12  ;;  %v339_v12 = vld [vmem:[%s5132_s4 + $0x60] sm:$0xff] }
  0x21   :  { %2681 = vmatprep.subr.mxu0 %v64_v13 }
  0x22   :  { %2682 = vmatpush3.msra.mxu0 %v64_v13  ;;  %v337_v13 = vld [vmem:[%s5132_s4 + $0x50] sm:$0xff] }
  0x23   :  { %2683 = vmatprep.subr.mxu0 %v63_v14 }
  0x24   :  { %2684 = vmatpush3.msra.mxu0 %v63_v14  ;;  %v336_v14 = vld [vmem:[%s5132_s4 + $0x48] sm:$0xff] }
  0x25   :  { %2685 = vmatprep.subr.mxu0 %v62_v15 }
  0x26   :  { %2686 = vmatpush3.msra.mxu0 %v62_v15  ;;  %v334_v15 = vld [vmem:[%s5132_s4 + $0x38] sm:$0xff] }
  0x27   :  { %2687 = vmatprep.subr.mxu0 %v61_v16 }
  0x28   :  { %2688 = vmatpush3.msra.mxu0 %v61_v16  ;;  %v333_v16 = vld [vmem:[%s5132_s4 + $0x30] sm:$0xff] }
  0x29   :  { %2690 = vmatmul.mubr.f32.vlgmr.msra.gmra.mxu0 %v54_v17  ;;  %2729 = vmatprep.subr.mxu0 %v374_v25  ;;  %v335_v17 = vld [vmem:[%s5132_s4 + $0x40] sm:$0xff] }
  0x2a   :  { %2692 = vmatprep.mubr.f32.mxu0 %v55_v18  ;;  %2730 = vmatpush3.msra.mxu0 %v374_v25  ;;  %v331_v18 = vld [vmem:[%s5132_s4 + $0x20] sm:$0xff]  ;;  %v3662_v25 = vld [vmem:[%s5133_s5 + $0x170] sm:$0xff] }
  0x2b   :  { %2731 = vmatprep.subr.mxu0 %v371_v26  ;;  %5182 = vst [vmem:[#allocation2_spill] sm:$0xff] %v3662_v25 }
  0x2c   :  { %2732 = vmatpush3.msra.mxu0 %v371_v26 }
  0x2d   :  { %2693 = vmatmul.mubr.f32.gmra.mxu0 %v56_v19  ;;  %2733 = vmatprep.subr.mxu0 %v368_v27  ;;  %v330_v19 = vld [vmem:[%s5132_s4 + $0x18] sm:$0xff] }
  0x2e   :  { %2695 = vmatprep.mubr.f32.mxu0 %v57_v20  ;;  %2734 = vmatpush3.msra.mxu0 %v368_v27  ;;  %v332_v20 = vld [vmem:[%s5132_s4 + $0x28] sm:$0xff]  ;;  %v2360_v27 = vld [vmem:[%s5134_s3] ss:$0 sm:$0xff] }
  0x2f   :  { %2735 = vmatprep.subr.mxu0 %v365_v28 }
  0x30   :  { %2736 = vmatpush3.msra.mxu0 %v365_v28 }
  0x31   :  { %2696 = vmatmul.mubr.f32.gmra.mxu0 %v58_v21  ;;  %2737 = vmatprep.subr.mxu0 %v362_v29  ;;  %v328_v21 = vld [vmem:[%s5132_s4 + $0x8] sm:$0xff] }
  0x32   :  { %2698 = vmatprep.mubr.f32.mxu0 %v59_v22  ;;  %2738 = vmatpush3.msra.mxu0 %v362_v29  ;;  %v327_v22 = vld [vmem:[%s5132_s4] sm:$0xff] }
  0x33   :  { %2739 = vmatprep.subr.mxu0 %v359_v30 }
  0x34   :  { %2740 = vmatpush3.msra.mxu0 %v359_v30  ;;  %v3672_v30 = vld [vmem:[%s5133_s5 + $0x168] sm:$0xff] }
  0x35   :  { %2699 = vmatmul.mubr.f32.gmra.mxu0 %v60_v23  ;;  %2741 = vmatprep.subr.mxu0 %v356_v31  ;;  %v329_v23 = vld [vmem:[%s5132_s4 + $0x10] sm:$0xff] }
  0x36   :  { %2742 = vmatpush3.msra.mxu0 %v356_v31 }
  0x37   :  { %2743 = vmatprep.subr.mxu0 %v353_v32 }
  0x38   :  { %2744 = vmatpush3.msra.mxu0 %v353_v32 }
  0x39   :  { %2745 = vmatprep.subr.mxu0 %v350_v33 }
  0x3a   :  { %2746 = vmatpush3.msra.mxu0 %v350_v33  ;;  %v3677_v33 = vld [vmem:[%s5133_s5 + $0x158] sm:$0xff] }
  0x3b   :  { %2747 = vmatprep.subr.mxu0 %v347_v34 }
  0x3c   :  { %2748 = vmatpush3.msra.mxu0 %v347_v34  ;;  %v3682_v34 = vld [vmem:[%s5133_s5 + $0x150] sm:$0xff] }
  0x3d   :  { %2749 = vmatprep.subr.mxu0 %v344_v35 }
  0x3e   :  { %2750 = vmatpush3.msra.mxu0 %v344_v35  ;;  %v3687_v35 = vld [vmem:[%s5133_s5 + $0x178] sm:$0xff] }
  0x3f   :  { %2751 = vmatprep.subr.mxu0 %v341_v36 }
  0x40   :  { %2752 = vmatpush3.msra.mxu0 %v341_v36 }
  0x41   :  { %2753 = vmatprep.subr.mxu0 %v338_v37 }
  0x42   :  { %2754 = vmatpush3.msra.mxu0 %v338_v37  ;;  %v3693_v37 = vld [vmem:[%s5133_s5 + $0x140] sm:$0xff] }
  0x43   :  { %2755 = vmatprep.subr.mxu0 %v335_v17 }
  0x44   :  { %2756 = vmatpush3.msra.mxu0 %v335_v17  ;;  %v3916_v17 = vld [vmem:[%s5133_s5 + $0xd0] sm:$0xff] }
  0x45   :  { %2757 = vmatprep.subr.mxu0 %v332_v20 }
  0x46   :  { %2758 = vmatpush3.msra.mxu0 %v332_v20  ;;  %v3943_v20 = vld [vmem:[%s5133_s5 + $0x88] sm:$0xff] }
  0x47   :  { %2759 = vmatprep.subr.mxu0 %v329_v23 }
  0x48   :  { %2760 = vmatpush3.msra.mxu0 %v329_v23  ;;  %v3970_v23 = vld [vmem:[%s5133_s5 + $0x40] sm:$0xff] }
  0x49   :  { %2773 = vmatprep.subr.mxu0 %v5147_v24  ;;  %5188 = vst [vmem:[#allocation8_spill] sm:$0xff] %v3970_v23 }
  0xe9   :  { %v2691_v38 = vpop.f32.mrf.mxu0 }
  0xeb   :  { %v143_v39 = vpop.f32.mrf.mxu0 }
  0xed   :  { %v2694_v40 = vpop.f32.mrf.mxu0 }
  0xef   :  { %v153_v41 = vpop.f32.mrf.mxu0 }
  0xf1   :  { %v2697_v42 = vpop.f32.mrf.mxu0 }
  0xf3   :  { %v163_v43 = vpop.f32.mrf.mxu0 }
  0xf5   :  { %v2700_v44 = vpop.f32.mrf.mxu0 }
  0xf6   :  { %2701 = vmatprep.subr.mxu1 %v2700_v44 }
  0xf7   :  { %v173_v45 = vpop.f32.mrf.mxu0  ;;  %2702 = vmatpush3.msra.mxu1 %v2700_v44  ;;  %v3719_v44 = vld [vmem:[%s5133_s5 + $0x110] sm:$0xff] }
  0xf8   :  { %2703 = vmatprep.subr.mxu1 %v173_v45 }
  0xf9   :  { %2704 = vmatpush3.msra.mxu1 %v173_v45 }
  0xfa   :  { %2705 = vmatprep.subr.mxu1 %v2697_v42 }
  0xfb   :  { %2706 = vmatpush3.msra.mxu1 %v2697_v42 }
  0xfc   :  { %2707 = vmatprep.subr.mxu1 %v163_v43 }
  0xfd   :  { %2708 = vmatpush3.msra.mxu1 %v163_v43  ;;  %v3713_v43 = vld [vmem:[%s5133_s5 + $0x120] sm:$0xff] }
  0xfe   :  { %2709 = vmatprep.subr.mxu1 %v2694_v40 }
  0xff   :  { %2710 = vmatpush3.msra.mxu1 %v2694_v40  ;;  %v3700_v40 = vld [vmem:[%s5133_s5 + $0x138] sm:$0xff] }
 0x100   :  { %2711 = vmatprep.subr.mxu1 %v153_v41 }
 0x101   :  { %2712 = vmatpush3.msra.mxu1 %v153_v41  ;;  %v3706_v41 = vld [vmem:[%s5133_s5 + $0x128] sm:$0xff] }
 0x102   :  { %2713 = vmatprep.subr.mxu1 %v2691_v38 }
 0x103   :  { %2714 = vmatpush3.msra.mxu1 %v2691_v38 }
 0x104   :  { %2715 = vmatprep.subr.mxu1 %v143_v39 }
 0x105   :  { %2716 = vmatpush3.msra.mxu1 %v143_v39 }
 0x106   :  { %2718 = vmatmul.mubr.msk.f32.vlgmr.msra.gmra.mxu1 %vm197_vm0, %v183_v46  ;;  %392 = vmatprep.subr.mxu1 %v373_v47  ;;  %v3725_v47 = vld [vmem:[%s5133_s5 + $0x108] sm:$0xff] }
 0x107   :  { %2720 = vmatprep.mubr.msk.f32.mxu1 %vm197_vm0, %v184_v48  ;;  %393 = vmatpush1.msra.mxu1 %v372_v49  ;;  %v3732_v49 = vld [vmem:[%s5133_s5 + $0xf8] sm:$0xff] }
 0x108   :  { %394 = vmatprep.subr.mxu1 %v370_v50 }
 0x109   :  { %395 = vmatpush1.msra.mxu1 %v369_v51  ;;  %v3738_v51 = vld [vmem:[%s5133_s5 + $0xf0] sm:$0xff] }
 0x10a   :  { %2721 = vmatmul.mubr.msk.f32.gmra.mxu1 %vm197_vm0, %v185_v52  ;;  %396 = vmatprep.subr.mxu1 %v367_v53  ;;  %v3745_v52 = vld [vmem:[%s5133_s5 + $0xe0] sm:$0xff] }
 0x10b   :  { %2723 = vmatprep.mubr.msk.f32.mxu1 %vm197_vm0, %v186_v54  ;;  %397 = vmatpush1.msra.mxu1 %v366_v55  ;;  %v3751_v54 = vld [vmem:[%s5133_s5 + $0xd8] sm:$0xff] }
 0x10c   :  { %398 = vmatprep.subr.mxu1 %v364_v56  ;;  %v3757_v56 = vld [vmem:[%s5133_s5 + $0xc8] sm:$0xff] }
 0x10d   :  { %399 = vmatpush1.msra.mxu1 %v363_v57 }
 0x10e   :  { %2724 = vmatmul.mubr.msk.f32.gmra.mxu1 %vm197_vm0, %v187_v58  ;;  %400 = vmatprep.subr.mxu1 %v361_v59  ;;  %v3763_v58 = vld [vmem:[%s5133_s5 + $0xc0] sm:$0xff]  ;;  %v3770_v59 = vld [vmem:[%s5133_s5 + $0xb0] sm:$0xff] }
 0x10f   :  { %2726 = vmatprep.mubr.msk.f32.mxu1 %vm197_vm0, %v188_v60  ;;  %401 = vmatpush1.msra.mxu1 %v360_v61  ;;  %v3776_v60 = vld [vmem:[%s5133_s5 + $0xa8] sm:$0xff]  ;;  %v3782_v61 = vld [vmem:[%s5133_s5 + $0x98] sm:$0xff] }
 0x110   :  { %402 = vmatprep.subr.mxu1 %v358_v62  ;;  %v3788_v62 = vld [vmem:[%s5133_s5 + $0x90] sm:$0xff] }
 0x111   :  { %403 = vmatpush1.msra.mxu1 %v357_v63  ;;  %v3793_v63 = vld [vmem:[%s5133_s5 + $0x160] sm:$0xff] }
 0x112   :  { %2727 = vmatmul.mubr.msk.f32.gmra.mxu1 %vm197_vm0, %v189_v0  ;;  %404 = vmatprep.subr.mxu1 %v355_v1  ;;  %v3800_v0 = vld [vmem:[%s5133_s5 + $0x80] sm:$0xff]  ;;  %v3806_v1 = vld [vmem:[%s5133_s5 + $0x78] sm:$0xff] }
 0x113   :  { %405 = vmatpush1.msra.mxu1 %v354_v2  ;;  %456 = vmatprep.mubr.f32.mxu1 %v5147_v24  ;;  %v3813_v2 = vld [vmem:[%s5133_s5 + $0x68] sm:$0xff] }
 0x114   :  { %406 = vmatprep.subr.mxu1 %v352_v3  ;;  %v3820_v3 = vld [vmem:[%s5133_s5 + $0x60] sm:$0xff] }
 0x115   :  { %407 = vmatpush1.msra.mxu1 %v351_v4  ;;  %v3825_v4 = vld [vmem:[%s5133_s5 + $0x148] sm:$0xff] }
 0x116   :  { %408 = vmatprep.subr.mxu1 %v349_v5  ;;  %v3832_v5 = vld [vmem:[%s5133_s5 + $0x50] sm:$0xff] }
 0x117   :  { %409 = vmatpush1.msra.mxu1 %v348_v6  ;;  %v3838_v6 = vld [vmem:[%s5133_s5 + $0x48] sm:$0xff] }
 0x118   :  { %410 = vmatprep.subr.mxu1 %v346_v7  ;;  %v3845_v7 = vld [vmem:[%s5133_s5 + $0x38] sm:$0xff] }
 0x119   :  { %411 = vmatpush1.msra.mxu1 %v345_v8  ;;  %v3852_v8 = vld [vmem:[%s5133_s5 + $0x30] sm:$0xff] }
 0x11a   :  { %412 = vmatprep.subr.mxu1 %v343_v9  ;;  %5183 = vst [vmem:[#allocation3_spill] sm:$0xff] %v3852_v8  ;;  %v3857_v9 = vld [vmem:[%s5133_s5 + $0x130] sm:$0xff] }
 0x11b   :  { %413 = vmatpush1.msra.mxu1 %v342_v10  ;;  %v3864_v10 = vld [vmem:[%s5133_s5 + $0x20] sm:$0xff] }
 0x11c   :  { %414 = vmatprep.subr.mxu1 %v340_v11  ;;  %5184 = vst [vmem:[#allocation4_spill] sm:$0xff] %v3864_v10  ;;  %v3870_v11 = vld [vmem:[%s5133_s5 + $0x18] sm:$0xff] }
 0x11d   :  { %415 = vmatpush1.msra.mxu1 %v339_v12  ;;  %5185 = vst [vmem:[#allocation5_spill] sm:$0xff] %v3870_v11  ;;  %v3877_v12 = vld [vmem:[%s5133_s5 + $0x8] sm:$0xff] }
 0x11e   :  { %416 = vmatprep.subr.mxu1 %v337_v13  ;;  %5186 = vst [vmem:[#allocation6_spill] sm:$0xff] %v3877_v12  ;;  %v3884_v13 = vld [vmem:[%s5133_s5] sm:$0xff] }
 0x11f   :  { %417 = vmatpush1.msra.mxu1 %v336_v14  ;;  %5187 = vst [vmem:[#allocation7_spill] sm:$0xff] %v3884_v13  ;;  %v3889_v14 = vld [vmem:[%s5133_s5 + $0x118] sm:$0xff] }
 0x120   :  { %418 = vmatprep.subr.mxu1 %v334_v15  ;;  %v3898_v15 = vld [vmem:[%s5133_s5 + $0x100] sm:$0xff] }
 0x121   :  { %419 = vmatpush1.msra.mxu1 %v333_v16  ;;  %v3907_v16 = vld [vmem:[%s5133_s5 + $0xe8] sm:$0xff] }
 0x122   :  { %420 = vmatprep.subr.mxu1 %v331_v18  ;;  %v3925_v18 = vld [vmem:[%s5133_s5 + $0xb8] sm:$0xff] }
 0x123   :  { %421 = vmatpush1.msra.mxu1 %v330_v19  ;;  %v3934_v19 = vld [vmem:[%s5133_s5 + $0xa0] sm:$0xff] }
 0x124   :  { %422 = vmatprep.subr.mxu1 %v328_v21  ;;  %v3952_v21 = vld [vmem:[%s5133_s5 + $0x70] sm:$0xff] }
 0x125   :  { %423 = vmatpush1.msra.mxu1 %v327_v22  ;;  %v3961_v22 = vld [vmem:[%s5133_s5 + $0x58] sm:$0xff] }
 0x126   :  { %675 = vmatprep.subr.mxu1 %v3662_v25 }
 0x1c6   :  { %v2719_v26 = vpop.f32.mrf.mxu1 }
 0x1c7   :  { %v294_v31 = vadd.f32 %v2719_v26, %v2360_v27  ;;  %v3979_v26 = vld [vmem:[%s5133_s5 + $0x28] sm:$0xff] }
 0x1c8   :  { %v288_v28 = vpop.f32.mrf.mxu1  ;;  %5189 = vst [vmem:[#allocation9_spill] sm:$0xff] %v3979_v26 }
 0x1c9   :  { %v289_v29 = vadd.f32 %v2360_v27, %v288_v28  ;;  %v377_v28 = vlaneseq }
 0x1ca   :  { %v2722_v32 = vpop.f32.mrf.mxu1 }
 0x1cb   :  { %457 = vmatmul.mubr.f32.vlgmr.msra.gmra.mxu1 %v289_v29  ;;  %2761 = vmatprep.mubr.f32.mxu0 %v289_v29  ;;  %v304_v38 = vadd.f32 %v2722_v32, %v2360_v27  ;;  %v4047_v29 = vshrl.u32 %v377_v28, 7  ;;  %v375_v32 = vld [vmem:[%s5135_s6] sm:$0x7] }
 0x1cc   :  { %676 = vmatpush1.msra.mxu1 %v3672_v30  ;;  %v298_v36 = vpop.f32.mrf.mxu1  ;;  %2762 = vmatmul.mubr.f32.vlgmr.msra.gmra.mxu0 %v294_v31 }
 0x1cd   :  { %v299_v39 = vadd.f32 %v2360_v27, %v298_v36  ;;  %677 = vmatprep.subr.mxu1 %v3677_v33  ;;  %462 = vmatprep.mubr.f32.mxu1 %v5147_v24 }
 0x1ce   :  { %678 = vmatpush1.msra.mxu1 %v3682_v34  ;;  %v2725_v42 = vpop.f32.mrf.mxu1  ;;  %2774 = vmatpush3.msra.mxu0 %v3687_v35 }
 0x1cf   :  { %679 = vmatprep.subr.mxu1 %v3693_v37  ;;  %463 = vmatmul.mubr.f32.gmra.mxu1 %v294_v31  ;;  %v314_v48 = vadd.f32 %v2725_v42, %v2360_v27  ;;  %v5149_v31 = vsub.s32 2, %v4047_v29 }
 0x1d0   :  { %2764 = vmatprep.mubr.f32.mxu0 %v299_v39  ;;  %680 = vmatpush1.msra.mxu1 %v3700_v40  ;;  %v308_v45 = vpop.f32.mrf.mxu1 }
 0x1d1   :  { %2765 = vmatmul.mubr.f32.gmra.mxu0 %v304_v38  ;;  %681 = vmatprep.subr.mxu1 %v3706_v41  ;;  %v309_v46 = vadd.f32 %v2360_v27, %v308_v45  ;;  %v4055_v36 = vrot.slane %v375_v32, %v5149_v31  ;;  %v383_v45 = vsub.s32 1, %v4047_v29 }
 0x1d2   :  { %682 = vmatpush1.msra.mxu1 %v3713_v43  ;;  %468 = vmatprep.mubr.f32.mxu1 %v5147_v24  ;;  %v2728_v50 = vpop.f32.mrf.mxu1 }
 0x1d3   :  { %683 = vmatprep.subr.mxu1 %v3719_v44  ;;  %469 = vmatmul.mubr.f32.gmra.mxu1 %v299_v39  ;;  %v324_v57 = vadd.f32 %v2728_v50, %v2360_v27 }
 0x1d4   :  { %684 = vmatpush1.msra.mxu1 %v3725_v47  ;;  %474 = vmatprep.mubr.f32.mxu1 %v5147_v24  ;;  %v318_v53 = vpop.f32.mrf.mxu1 }
 0x1d5   :  { %685 = vmatprep.subr.mxu1 %v3732_v49  ;;  %2767 = vmatprep.mubr.f32.mxu0 %v309_v46  ;;  %v319_v55 = vadd.f32 %v2360_v27, %v318_v53  ;;  %v3988_v27 = vld [vmem:[%s5133_s5 + $0x10] sm:$0xff] }
 0x1d6   :  { %686 = vmatpush1.msra.mxu1 %v3738_v51  ;;  %2768 = vmatmul.mubr.f32.gmra.mxu0 %v314_v48  ;;  %5190 = vst [vmem:[#allocation10_spill] sm:$0xff] %v3988_v27 }
 0x1d7   :  { %687 = vmatprep.subr.mxu1 %v3745_v52  ;;  %475 = vmatmul.mubr.f32.gmra.mxu1 %v304_v38  ;;  %v379_v38 = vsub.s32 0, %v4047_v29 }
 0x1d8   :  { %688 = vmatpush1.msra.mxu1 %v3751_v54  ;;  %480 = vmatprep.mubr.f32.mxu1 %v5147_v24 }
 0x1d9   :  { %689 = vmatprep.subr.mxu1 %v3757_v56  ;;  %2770 = vmatprep.mubr.f32.mxu0 %v319_v55  ;;  %v380_v50 = vrot.slane %v375_v32, %v379_v38 }
 0x1da   :  { %690 = vmatpush1.msra.mxu1 %v3763_v58  ;;  %2771 = vmatmul.mubr.f32.gmra.mxu0 %v324_v57 }
 0x1db   :  { %691 = vmatprep.subr.mxu1 %v3770_v59  ;;  %481 = vmatmul.mubr.f32.gmra.mxu1 %v309_v46 }
 0x1dc   :  { %692 = vmatpush1.msra.mxu1 %v3776_v60  ;;  %486 = vmatprep.mubr.f32.mxu1 %v5147_v24 }
 0x1dd   :  { %693 = vmatprep.subr.mxu1 %v3782_v61  ;;  %2775 = vmatprep.subr.mxu0 %v5147_v24 }
 0x1de   :  { %694 = vmatpush1.msra.mxu1 %v3788_v62  ;;  %2776 = vmatpush3.msra.mxu0 %v3793_v63 }
 0x1df   :  { %695 = vmatprep.subr.mxu1 %v3800_v0  ;;  %487 = vmatmul.mubr.f32.gmra.mxu1 %v314_v48 }
 0x1e0   :  { %696 = vmatpush1.msra.mxu1 %v3806_v1  ;;  %492 = vmatprep.mubr.f32.mxu1 %v5147_v24 }
 0x1e1   :  { %697 = vmatprep.subr.mxu1 %v3813_v2  ;;  %2777 = vmatprep.subr.mxu0 %v5147_v24 }
 0x1e2   :  { %698 = vmatpush1.msra.mxu1 %v3820_v3  ;;  %2778 = vmatpush3.msra.mxu0 %v3825_v4 }
 0x1e3   :  { %699 = vmatprep.subr.mxu1 %v3832_v5  ;;  %493 = vmatmul.mubr.f32.gmra.mxu1 %v319_v55 }
 0x1e4   :  { %700 = vmatpush1.msra.mxu1 %v3838_v6  ;;  %498 = vmatprep.mubr.f32.mxu1 %v5147_v24 }
 0x1e5   :  { %701 = vmatprep.subr.mxu1 %v3845_v7  ;;  %2779 = vmatprep.subr.mxu0 %v5147_v24 }
 0x1e6   :  { %702 = vmatpush1.msra.mxu1 %v3852_v8  ;;  %2780 = vmatpush3.msra.mxu0 %v3857_v9 }
 0x1e7   :  { %703 = vmatprep.subr.mxu1 %v3864_v10  ;;  %499 = vmatmul.mubr.f32.gmra.mxu1 %v324_v57  ;;  %v384_v57 = vrot.slane %v375_v32, %v383_v45 }
 0x1e8   :  { %704 = vmatpush1.msra.mxu1 %v3870_v11  ;;  %739 = vmatprep.mubr.f32.mxu1 %v5147_v24 }
 0x1e9   :  { %705 = vmatprep.subr.mxu1 %v3877_v12  ;;  %2781 = vmatprep.subr.mxu0 %v5147_v24 }
 0x1ea   :  { %706 = vmatpush1.msra.mxu1 %v3884_v13  ;;  %2782 = vmatpush3.msra.mxu0 %v3889_v14 }
 0x1eb   :  { %740 = vmatmul.mubr.f32.vlgmr.msra.gmra.mxu1 %v5147_v24  ;;  %2783 = vmatprep.subr.mxu0 %v5147_v24 }
 0x1ec   :  { %2784 = vmatpush3.msra.mxu0 %v3898_v15  ;;  %2805 = vmatprep.mubr.msk.f32.mxu0 %vm3324_vm1, %v5147_v24 }
 0x1ed   :  { %2785 = vmatprep.subr.mxu0 %v5147_v24  ;;  %838 = vmatprep.subr.mxu1 %v3662_v25 }
 0x1ee   :  { %2786 = vmatpush3.msra.mxu0 %v3907_v16  ;;  %839 = vmatpush1.msra.mxu1 %v3672_v30 }
 0x1ef   :  { %2787 = vmatprep.subr.mxu0 %v5147_v24  ;;  %840 = vmatprep.subr.mxu1 %v3677_v33 }
 0x1f0   :  { %2788 = vmatpush3.msra.mxu0 %v3916_v17  ;;  %841 = vmatpush1.msra.mxu1 %v3682_v34 }
 0x1f1   :  { %2789 = vmatprep.subr.mxu0 %v5147_v24  ;;  %842 = vmatprep.subr.mxu1 %v3693_v37 }
 0x1f2   :  { %2790 = vmatpush3.msra.mxu0 %v3925_v18  ;;  %843 = vmatpush1.msra.mxu1 %v3700_v40 }
 0x1f3   :  { %2791 = vmatprep.subr.mxu0 %v5147_v24  ;;  %844 = vmatprep.subr.mxu1 %v3706_v41 }
 0x1f4   :  { %2792 = vmatpush3.msra.mxu0 %v3934_v19  ;;  %845 = vmatpush1.msra.mxu1 %v3713_v43 }
 0x1f5   :  { %2793 = vmatprep.subr.mxu0 %v5147_v24  ;;  %846 = vmatprep.subr.mxu1 %v3719_v44 }
 0x1f6   :  { %2794 = vmatpush3.msra.mxu0 %v3943_v20  ;;  %847 = vmatpush1.msra.mxu1 %v3725_v47 }
 0x1f7   :  { %2795 = vmatprep.subr.mxu0 %v5147_v24  ;;  %848 = vmatprep.subr.mxu1 %v3732_v49 }
 0x1f8   :  { %2796 = vmatpush3.msra.mxu0 %v3952_v21  ;;  %849 = vmatpush1.msra.mxu1 %v3738_v51 }
 0x1f9   :  { %2797 = vmatprep.subr.mxu0 %v5147_v24  ;;  %850 = vmatprep.subr.mxu1 %v3745_v52 }
 0x1fa   :  { %2798 = vmatpush3.msra.mxu0 %v3961_v22  ;;  %851 = vmatpush1.msra.mxu1 %v3751_v54 }
 0x1fb   :  { %2799 = vmatprep.subr.mxu0 %v5147_v24  ;;  %852 = vmatprep.subr.mxu1 %v3757_v56 }
 0x1fc   :  { %2800 = vmatpush3.msra.mxu0 %v3970_v23  ;;  %853 = vmatpush1.msra.mxu1 %v3763_v58 }
 0x1fd   :  { %2801 = vmatprep.subr.mxu0 %v5147_v24  ;;  %854 = vmatprep.subr.mxu1 %v3770_v59 }
 0x1fe   :  { %2802 = vmatpush3.msra.mxu0 %v3979_v26  ;;  %855 = vmatpush1.msra.mxu1 %v3776_v60 }
 0x1ff   :  { %2803 = vmatprep.subr.mxu0 %v5147_v24  ;;  %856 = vmatprep.subr.mxu1 %v3782_v61 }
 0x200   :  { %2804 = vmatpush3.msra.mxu0 %v3988_v27  ;;  %857 = vmatpush1.msra.mxu1 %v3788_v62 }
 0x201   :  { %2806 = vmatmul.mubr.f32.vlgmr.msra.gmra.mxu0 %v5147_v24  ;;  %2808 = vmatprep.subr.mxu0 %v5147_v24 }
 0x202   :  { %2809 = vmatpush3.msra.mxu0 %v3687_v35  ;;  %858 = vmatprep.subr.mxu1 %v3800_v0 }
 0x203   :  { %2810 = vmatprep.subr.mxu0 %v5147_v24  ;;  %859 = vmatpush1.msra.mxu1 %v3806_v1 }
 0x204   :  { %2811 = vmatpush3.msra.mxu0 %v3793_v63  ;;  %860 = vmatprep.subr.mxu1 %v3813_v2 }
 0x205   :  { %2812 = vmatprep.subr.mxu0 %v5147_v24  ;;  %861 = vmatpush1.msra.mxu1 %v3820_v3 }
 0x206   :  { %2813 = vmatpush3.msra.mxu0 %v3825_v4  ;;  %862 = vmatprep.subr.mxu1 %v3832_v5 }
 0x207   :  { %2814 = vmatprep.subr.mxu0 %v5147_v24  ;;  %863 = vmatpush1.msra.mxu1 %v3838_v6 }
 0x208   :  { %2815 = vmatpush3.msra.mxu0 %v3857_v9  ;;  %864 = vmatprep.subr.mxu1 %v3845_v7 }
 0x209   :  { %2816 = vmatprep.subr.mxu0 %v5147_v24  ;;  %865 = vmatpush1.msra.mxu1 %v3852_v8 }
 0x20a   :  { %2817 = vmatpush3.msra.mxu0 %v3889_v14  ;;  %866 = vmatprep.subr.mxu1 %v3864_v10 }
 0x20b   :  { %2818 = vmatprep.subr.mxu0 %v5147_v24  ;;  %867 = vmatpush1.msra.mxu1 %v3870_v11 }
 0x20c   :  { %2819 = vmatpush3.msra.mxu0 %v3898_v15  ;;  %868 = vmatprep.subr.mxu1 %v3877_v12 }
 0x20d   :  { %2820 = vmatprep.subr.mxu0 %v5147_v24  ;;  %869 = vmatpush1.msra.mxu1 %v3884_v13 }
 0x20e   :  { %2821 = vmatpush3.msra.mxu0 %v3907_v16  ;;  %902 = vmatprep.mubr.f32.mxu1 %v5147_v24 }
 0x20f   :  { %2822 = vmatprep.subr.mxu0 %v5147_v24  ;;  %2840 = vmatprep.mubr.msk.f32.mxu0 %vm3324_vm1, %v5147_v24 }
 0x210   :  { %2823 = vmatpush3.msra.mxu0 %v3916_v17  ;;  %1001 = vmatprep.subr.mxu1 %v3662_v25 }
 0x211   :  { %2824 = vmatprep.subr.mxu0 %v5147_v24 }
 0x212   :  { %2825 = vmatpush3.msra.mxu0 %v3925_v18 }
 0x213   :  { %2826 = vmatprep.subr.mxu0 %v5147_v24 }
 0x214   :  { %2827 = vmatpush3.msra.mxu0 %v3934_v19 }
 0x215   :  { %2828 = vmatprep.subr.mxu0 %v5147_v24 }
 0x216   :  { %2829 = vmatpush3.msra.mxu0 %v3943_v20 }
 0x217   :  { %2830 = vmatprep.subr.mxu0 %v5147_v24 }
 0x218   :  { %2831 = vmatpush3.msra.mxu0 %v3952_v21 }
 0x219   :  { %2832 = vmatprep.subr.mxu0 %v5147_v24 }
 0x21a   :  { %2833 = vmatpush3.msra.mxu0 %v3961_v22 }
 0x21b   :  { %2834 = vmatprep.subr.mxu0 %v5147_v24 }
 0x21c   :  { %2835 = vmatpush3.msra.mxu0 %v3970_v23 }
 0x21d   :  { %2836 = vmatprep.subr.mxu0 %v5147_v24 }
 0x21e   :  { %2837 = vmatpush3.msra.mxu0 %v3979_v26 }
 0x21f   :  { %2838 = vmatprep.subr.mxu0 %v5147_v24 }
 0x220   :  { %2839 = vmatpush3.msra.mxu0 %v3988_v27 }
 0x221   :  { %2843 = vmatprep.subr.mxu0 %v5147_v24 }
 0x28b   :  { %v458_v39 = vpop.f32.mrf.mxu1 }
 0x28c   :  { %v2763_v42 = vpop.f32.mrf.mxu0 }
 0x28d   :  { %v4060_v46 = vadd.f32 %v2763_v42, %v4055_v36  ;;  %v460_v48 = vpop.f32.mrf.mxu1 }
 0x28e   :  { %v4062_v53 = vpop.f32.mrf.mxu0 }
 0x28f   :  { %5191 = vst [vmem:[#allocation11_spill] sm:$0xff] %v4060_v46  ;;  %v464_v55 = vpop.f32.mrf.mxu1 }
 0x290   :  { %v4064_v28 = vadd.f32 %v464_v55, %v380_v50 }
 0x291   :  { %v2766_v24 = vpop.f32.mrf.mxu0  ;;  %v466_v31 = vpop.f32.mrf.mxu1 }
 0x292   :  { %5192 = vst [vmem:[#allocation12_spill] sm:$0xff] %v4064_v28  ;;  %v4067_v25 = vadd.f32 %v2766_v24, %v4055_v36  ;;  %v4069_v27 = vadd.f32 %v466_v31, %v384_v57 }
 0x293   :  { %v581_v13 = vpop.f32.mrf.mxu0  ;;  %v470_v12 = vpop.f32.mrf.mxu1 }
 0x294   :  { %5193 = vst [vmem:[#allocation13_spill] sm:$0xff] %v4067_v25  ;;  %5194 = vst [vmem:[#allocation14_spill] sm:$0xff] %v4069_v27  ;;  %v4072_v42 = vadd.f32 %v581_v13, %v4055_v36  ;;  %v4074_v46 = vadd.f32 %v470_v12, %v380_v50 }
 0x295   :  { %v472_v26 = vpop.f32.mrf.mxu1 }
 0x296   :  { %5195 = vst [vmem:[#allocation15_spill] sm:$0xff] %v4072_v42  ;;  %5196 = vst [vmem:[#allocation16_spill] sm:$0xff] %v4074_v46  ;;  %v4076_v11 = vadd.f32 %v472_v26, %v384_v57  ;;  %v2769_v32 = vpop.f32.mrf.mxu0 }
 0x297   :  { %v476_v55 = vpop.f32.mrf.mxu1  ;;  %v4079_v28 = vadd.f32 %v2769_v32, %v4055_v36 }
 0x298   :  { %5197 = vst [vmem:[#allocation17_spill] sm:$0xff] %v4076_v11  ;;  %v4081_v10 = vadd.f32 %v476_v55, %v380_v50  ;;  %v591_v24 = vpop.f32.mrf.mxu0 }
 0x299   :  { %5198 = vst [vmem:[#allocation18_spill] sm:$0xff] %v4079_v28  ;;  %v478_v31 = vpop.f32.mrf.mxu1  ;;  %v4084_v25 = vadd.f32 %v591_v24, %v4055_v36 }
 0x29a   :  { %5199 = vst [vmem:[#allocation19_spill] sm:$0xff] %v4081_v10  ;;  %v4086_v27 = vadd.f32 %v478_v31, %v384_v57  ;;  %v2772_v13 = vpop.f32.mrf.mxu0 }
 0x29b   :  { %5200 = vst [vmem:[#allocation20_spill] sm:$0xff] %v4084_v25  ;;  %v482_v12 = vpop.f32.mrf.mxu1  ;;  %v4089_v42 = vadd.f32 %v2772_v13, %v4055_v36 }
 0x29c   :  { %5201 = vst [vmem:[#allocation21_spill] sm:$0xff] %v4086_v27  ;;  %v4091_v26 = vadd.f32 %v482_v12, %v380_v50  ;;  %v601_v11 = vpop.f32.mrf.mxu0  ;;  %v658_v12 = vld [vmem:[%s5136_s7] sm:$0x7] }
 0x29d   :  { %5202 = vst [vmem:[#allocation22_spill] sm:$0xff] %v4089_v42  ;;  %v484_v46 = vpop.f32.mrf.mxu1  ;;  %v4094_v32 = vadd.f32 %v601_v11, %v4055_v36 }
 0x29e   :  { %5203 = vst [vmem:[#allocation23_spill] sm:$0xff] %v4091_v26  ;;  %v4096_v55 = vadd.f32 %v484_v46, %v384_v57  ;;  %v4111_v46 = vrot.slane %v658_v12, %v379_v38 }
 0x29f   :  { %5204 = vst [vmem:[#allocation24_spill] sm:$0xff] %v4094_v32  ;;  %v488_v28 = vpop.f32.mrf.mxu1 }
 0x2a0   :  { %5205 = vst [vmem:[#allocation25_spill] sm:$0xff] %v4096_v55  ;;  %v4098_v10 = vadd.f32 %v488_v28, %v380_v50  ;;  %5211 = vst [vmem:[#allocation31_spill] sm:$0xff] %v4111_v46 }
 0x2a1   :  { %v490_v24 = vpop.f32.mrf.mxu1 }
 0x2a2   :  { %5206 = vst [vmem:[#allocation26_spill] sm:$0xff] %v4098_v10  ;;  %v4100_v31 = vadd.f32 %v490_v24, %v384_v57 }
 0x2a3   :  { %v494_v25 = vpop.f32.mrf.mxu1 }
 0x2a4   :  { %5207 = vst [vmem:[#allocation27_spill] sm:$0xff] %v4100_v31  ;;  %v4102_v27 = vadd.f32 %v494_v25, %v380_v50  ;;  %v459_v31 = vadd.f32 %v458_v39, %v380_v50  ;;  %v5213_v39 = vsub.s32 2, %v4047_v29 }
 0x2a5   :  { %v496_v13 = vpop.f32.mrf.mxu1 }
 0x2a6   :  { %5208 = vst [vmem:[#allocation28_spill] sm:$0xff] %v4102_v27  ;;  %v4107_v42 = vadd.f32 %v496_v13, %v384_v57  ;;  %v4116_v27 = vrot.slane %v658_v12, %v383_v45 }
 0x2a7   :  { %v500_v11 = vpop.f32.mrf.mxu1 }
 0x2a8   :  { %5209 = vst [vmem:[#allocation29_spill] sm:$0xff] %v4107_v42  ;;  %v4109_v32 = vadd.f32 %v500_v11, %v380_v50  ;;  %v461_v42 = vadd.f32 %v460_v48, %v384_v57  ;;  %v4121_v50 = vrot.slane %v658_v12, %v5213_v39  ;;  %v5217_v12 = vld [vmem:[#allocation8_spill] sm:$0xff]  ;;  %v5223_v39 = vld [vmem:[#allocation10_spill] sm:$0xff] }
 0x2a9   :  { %v502_v28 = vpop.f32.mrf.mxu1 }
 0x2aa   :  { %5210 = vst [vmem:[#allocation30_spill] sm:$0xff] %v4109_v32  ;;  %v4113_v10 = vadd.f32 %v502_v28, %v384_v57 }
 0x2ab   :  { %v741_v24 = vpop.f32.mrf.mxu1 }
 0x2ac   :  { %5212 = vst [vmem:[#allocation32_spill] sm:$0xff] %v4113_v10  ;;  %v742_v25 = vadd.f32 %v741_v24, %v4111_v46 }
 0x2ad   :  { %v743_v55 = vpop.f32.mrf.mxu1 }
 0x2ae   :  { %v816_v26 = vadd.f32 %v742_v25, %v459_v31  ;;  %v744_v13 = vadd.f32 %v743_v55, %v4116_v27  ;;  %v5218_v25 = vld [vmem:[#allocation4_spill] sm:$0xff] }
 0x2b0   :  { %v2369_v23 = vmul.f32 -1.442695, %v816_v26  ;;  %v823_v11 = vadd.f32 %v744_v13, %v461_v42  ;;  %v5219_v13 = vld [vmem:[#allocation5_spill] sm:$0xff] }
 0x2b2   :  { %3195 = vpow2.f32 %v2369_v23  ;;  %v2370_v32 = vmul.f32 -1.442695, %v823_v11  ;;  %v572_v23 = vadd.f32 %v4062_v53, %v4055_v36  ;;  %v5215_v36 = vmov 0.0   ;;  %v5216_v53 = vld [vmem:[#allocation3_spill] sm:$0xff]  ;;  %v5220_v11 = vld [vmem:[#allocation9_spill] sm:$0xff] }
 0x2b4   :  { %3197 = vpow2.f32 %v2370_v32 }
 0x2bf   :  { %v3196_v38 = vpop.eup %3195 }
 0x2c0   :  { %v820_v8 = vadd.f32 1.0, %v3196_v38  ;;  %v5221_v38 = vld [vmem:[#allocation6_spill] sm:$0xff] }
 0x2c1   :  { %v812_v28 = vpop.f32.mrf.mxu0  ;;  %v3198_v45 = vpop.eup %3197 }
 0x2c2   :  { %3199 = vrcp.f32 %v820_v8  ;;  %v827_v24 = vadd.f32 1.0, %v3198_v45  ;;  %v813_v26 = vadd.f32 %v812_v28, %v4121_v50  ;;  %v5222_v28 = vld [vmem:[#allocation7_spill] sm:$0xff]  ;;  %v5224_v45 = vld [vmem:[#allocation2_spill] sm:$0xff] }
 0x2c3   :  { %v2807_v10 = vpop.f32.mrf.mxu0 }
 0x2c4   :  { %3201 = vrcp.f32 %v827_v24 }
 0x2cf   :  { %v3200_v31 = vpop.eup %3199 }
 0x2d0   :  { %v830_v48 = vmul.f32 %v3200_v31, %v813_v26 }
 0x2d1   :  { %v3202_v42 = vpop.eup %3201 }
 0x2d2   :  { %v831_v57 = vadd.f32 %v830_v48, %v572_v23  ;;  %v833_v32 = vsub.f32 1.0, %v3202_v42  ;;  %v835_v55 = vmul.f32 0.0, %v3202_v42 }
 0x2d4   :  { %3203 = vtanh.f32 %v831_v57  ;;  %v5225_v57 = vld [vmem:[#allocation12_spill] sm:$0xff] }
 0x2e1   :  { %v3204_v8 = vpop.eup %3203 }
 0x2e2   :  { %v834_v10 = vmul.f32 %v3204_v8, %v833_v32 }
 0x2e4   :  { %v4126_v29 = vadd.f32 %v835_v55, %v834_v10  ;;  %v5226_v10 = vld [vmem:[#allocation14_spill] sm:$0xff] }
 0x2e6   :  { %5214 = vst [vmem:[#allocation33_spill] sm:$0xff] %v4126_v29  ;;  %903 = vmatmul.mubr.f32.vlgmr.msra.gmra.mxu1 %v4126_v29  ;;  %2841 = vmatmul.mubr.f32.vlgmr.msra.gmra.mxu0 %v4126_v29 }
 0x2e7   :  { %1002 = vmatpush1.msra.mxu1 %v3672_v30  ;;  %2844 = vmatpush3.msra.mxu0 %v3687_v35 }
 0x2e8   :  { %1003 = vmatprep.subr.mxu1 %v3677_v33  ;;  %2845 = vmatprep.subr.mxu0 %v5215_v36 }
 0x2e9   :  { %1004 = vmatpush1.msra.mxu1 %v3682_v34  ;;  %2846 = vmatpush3.msra.mxu0 %v3793_v63 }
 0x2ea   :  { %1005 = vmatprep.subr.mxu1 %v3693_v37  ;;  %2847 = vmatprep.subr.mxu0 %v5215_v36 }
 0x2eb   :  { %1006 = vmatpush1.msra.mxu1 %v3700_v40  ;;  %2848 = vmatpush3.msra.mxu0 %v3825_v4 }
 0x2ec   :  { %1007 = vmatprep.subr.mxu1 %v3706_v41  ;;  %2849 = vmatprep.subr.mxu0 %v5215_v36 }
 0x2ed   :  { %1008 = vmatpush1.msra.mxu1 %v3713_v43  ;;  %2850 = vmatpush3.msra.mxu0 %v3857_v9 }
 0x2ee   :  { %1009 = vmatprep.subr.mxu1 %v3719_v44  ;;  %2851 = vmatprep.subr.mxu0 %v5215_v36 }
 0x2ef   :  { %1010 = vmatpush1.msra.mxu1 %v3725_v47  ;;  %2852 = vmatpush3.msra.mxu0 %v3889_v14 }
 0x2f0   :  { %1011 = vmatprep.subr.mxu1 %v3732_v49  ;;  %2853 = vmatprep.subr.mxu0 %v5215_v36 }
 0x2f1   :  { %1012 = vmatpush1.msra.mxu1 %v3738_v51  ;;  %2854 = vmatpush3.msra.mxu0 %v3898_v15 }
 0x2f2   :  { %1013 = vmatprep.subr.mxu1 %v3745_v52  ;;  %2855 = vmatprep.subr.mxu0 %v5215_v36 }
 0x2f3   :  { %1014 = vmatpush1.msra.mxu1 %v3751_v54  ;;  %2856 = vmatpush3.msra.mxu0 %v3907_v16 }
 0x2f4   :  { %1015 = vmatprep.subr.mxu1 %v3757_v56  ;;  %2857 = vmatprep.subr.mxu0 %v5215_v36 }
 0x2f5   :  { %1016 = vmatpush1.msra.mxu1 %v3763_v58  ;;  %2858 = vmatpush3.msra.mxu0 %v3916_v17 }
 0x2f6   :  { %1017 = vmatprep.subr.mxu1 %v3770_v59  ;;  %2859 = vmatprep.subr.mxu0 %v5215_v36 }
 0x2f7   :  { %1018 = vmatpush1.msra.mxu1 %v3776_v60  ;;  %2860 = vmatpush3.msra.mxu0 %v3925_v18 }
 0x2f8   :  { %1019 = vmatprep.subr.mxu1 %v3782_v61  ;;  %2861 = vmatprep.subr.mxu0 %v5215_v36 }
 0x2f9   :  { %1020 = vmatpush1.msra.mxu1 %v3788_v62  ;;  %2862 = vmatpush3.msra.mxu0 %v3934_v19 }
 0x2fa   :  { %1021 = vmatprep.subr.mxu1 %v3800_v0  ;;  %2863 = vmatprep.subr.mxu0 %v5215_v36 }
 0x2fb   :  { %1022 = vmatpush1.msra.mxu1 %v3806_v1  ;;  %2864 = vmatpush3.msra.mxu0 %v3943_v20 }
 0x2fc   :  { %1023 = vmatprep.subr.mxu1 %v3813_v2  ;;  %2865 = vmatprep.subr.mxu0 %v5215_v36 }
 0x2fd   :  { %1024 = vmatpush1.msra.mxu1 %v3820_v3  ;;  %2866 = vmatpush3.msra.mxu0 %v3952_v21 }
 0x2fe   :  { %1025 = vmatprep.subr.mxu1 %v3832_v5  ;;  %2867 = vmatprep.subr.mxu0 %v5215_v36 }
 0x2ff   :  { %1026 = vmatpush1.msra.mxu1 %v3838_v6  ;;  %2868 = vmatpush3.msra.mxu0 %v3961_v22 }
 0x300   :  { %1027 = vmatprep.subr.mxu1 %v3845_v7  ;;  %2869 = vmatprep.subr.mxu0 %v5215_v36 }
 0x301   :  { %1028 = vmatpush1.msra.mxu1 %v5216_v53  ;;  %2870 = vmatpush3.msra.mxu0 %v5217_v12 }
 0x302   :  { %1029 = vmatprep.subr.mxu1 %v5218_v25  ;;  %2871 = vmatprep.subr.mxu0 %v5215_v36 }
 0x303   :  { %1030 = vmatpush1.msra.mxu1 %v5219_v13  ;;  %2872 = vmatpush3.msra.mxu0 %v5220_v11 }
 0x304   :  { %1031 = vmatprep.subr.mxu1 %v5221_v38  ;;  %2873 = vmatprep.subr.mxu0 %v5215_v36 }
 0x305   :  { %1032 = vmatpush1.msra.mxu1 %v5222_v28  ;;  %1065 = vmatprep.mubr.f32.mxu1 %v5215_v36 }
 0x306   :  { %2874 = vmatpush3.msra.mxu0 %v5223_v39  ;;  %2875 = vmatprep.mubr.msk.f32.mxu0 %vm3324_vm1, %v5215_v36 }
 0x307   :  { %1164 = vmatprep.subr.mxu1 %v5224_v45  ;;  %2878 = vmatprep.subr.mxu0 %v5215_v36 }
 0x3a6   :  { %v904_v24 = vpop.f32.mrf.mxu1  ;;  %v975_v26 = vpop.f32.mrf.mxu0 }
 0x3a7   :  { %v905_v31 = vadd.f32 %v904_v24, %v4111_v46  ;;  %v976_v13 = vadd.f32 %v975_v26, %v4121_v50 }
 0x3a8   :  { %v906_v23 = vpop.f32.mrf.mxu1  ;;  %v2842_v48 = vpop.f32.mrf.mxu0 }
 0x3a9   :  { %v979_v42 = vadd.f32 %v905_v31, %v5225_v57  ;;  %v907_v8 = vadd.f32 %v906_v23, %v4116_v27  ;;  %v5227_v48 = vld [vmem:[#allocation11_spill] sm:$0xff] }
 0x3ab   :  { %v2371_v32 = vmul.f32 -1.442695, %v979_v42  ;;  %v986_v55 = vadd.f32 %v907_v8, %v5226_v10 }
 0x3ad   :  { %3205 = vpow2.f32 %v2371_v32  ;;  %v2372_v39 = vmul.f32 -1.442695, %v986_v55  ;;  %v5235_v55 = vld [vmem:[#allocation31_spill] sm:$0xff] }
 0x3af   :  { %3207 = vpow2.f32 %v2372_v39 }
 0x3ba   :  { %v3206_v28 = vpop.eup %3205 }
 0x3bb   :  { %v983_v45 = vadd.f32 1.0, %v3206_v28  ;;  %v5233_v28 = vld [vmem:[#allocation10_spill] sm:$0xff] }
 0x3bc   :  { %v3208_v38 = vpop.eup %3207 }
 0x3bd   :  { %3209 = vrcp.f32 %v983_v45  ;;  %v990_v11 = vadd.f32 1.0, %v3208_v38  ;;  %v5232_v38 = vld [vmem:[#allocation7_spill] sm:$0xff]  ;;  %v5234_v45 = vld [vmem:[#allocation2_spill] sm:$0xff] }
 0x3bf   :  { %3211 = vrcp.f32 %v990_v11  ;;  %v5231_v11 = vld [vmem:[#allocation6_spill] sm:$0xff] }
 0x3ca   :  { %v3210_v24 = vpop.eup %3209 }
 0x3cb   :  { %v993_v46 = vmul.f32 %v3210_v24, %v976_v13  ;;  %v5230_v13 = vld [vmem:[#allocation9_spill] sm:$0xff] }
 0x3cc   :  { %v3212_v57 = vpop.eup %3211 }
 0x3cd   :  { %v994_v31 = vadd.f32 %v993_v46, %v5227_v48  ;;  %v996_v23 = vsub.f32 1.0, %v3212_v57  ;;  %v998_v8 = vmul.f32 %v3212_v57, %v4126_v29  ;;  %v5229_v46 = vld [vmem:[#allocation5_spill] sm:$0xff]  ;;  %v5236_v57 = vld [vmem:[#allocation16_spill] sm:$0xff] }
 0x3cf   :  { %3213 = vtanh.f32 %v994_v31 }
 0x3dc   :  { %v3214_v42 = vpop.eup %3213 }
 0x3dd   :  { %v997_v32 = vmul.f32 %v3214_v42, %v996_v23 }
 0x3df   :  { %v4204_v39 = vadd.f32 %v998_v8, %v997_v32  ;;  %v5237_v8 = vld [vmem:[#allocation17_spill] sm:$0xff] }
 0x3e1   :  { %5228 = vst [vmem:[#allocation3_spill] sm:$0xff] %v4204_v39  ;;  %1066 = vmatmul.mubr.f32.vlgmr.msra.gmra.mxu1 %v4204_v39  ;;  %2876 = vmatmul.mubr.f32.vlgmr.msra.gmra.mxu0 %v4204_v39 }
 0x3e2   :  { %1165 = vmatpush1.msra.mxu1 %v3672_v30  ;;  %2879 = vmatpush3.msra.mxu0 %v3687_v35 }
 0x3e3   :  { %1166 = vmatprep.subr.mxu1 %v3677_v33  ;;  %2880 = vmatprep.subr.mxu0 %v5215_v36 }
 0x3e4   :  { %1167 = vmatpush1.msra.mxu1 %v3682_v34  ;;  %2881 = vmatpush3.msra.mxu0 %v3793_v63 }
 0x3e5   :  { %1168 = vmatprep.subr.mxu1 %v3693_v37  ;;  %2882 = vmatprep.subr.mxu0 %v5215_v36 }
 0x3e6   :  { %1169 = vmatpush1.msra.mxu1 %v3700_v40  ;;  %2883 = vmatpush3.msra.mxu0 %v3825_v4 }
 0x3e7   :  { %1170 = vmatprep.subr.mxu1 %v3706_v41  ;;  %2884 = vmatprep.subr.mxu0 %v5215_v36 }
 0x3e8   :  { %1171 = vmatpush1.msra.mxu1 %v3713_v43  ;;  %2885 = vmatpush3.msra.mxu0 %v3857_v9 }
 0x3e9   :  { %1172 = vmatprep.subr.mxu1 %v3719_v44  ;;  %2886 = vmatprep.subr.mxu0 %v5215_v36 }
 0x3ea   :  { %1173 = vmatpush1.msra.mxu1 %v3725_v47  ;;  %2887 = vmatpush3.msra.mxu0 %v3889_v14 }
 0x3eb   :  { %1174 = vmatprep.subr.mxu1 %v3732_v49  ;;  %2888 = vmatprep.subr.mxu0 %v5215_v36 }
 0x3ec   :  { %1175 = vmatpush1.msra.mxu1 %v3738_v51  ;;  %2889 = vmatpush3.msra.mxu0 %v3898_v15 }
 0x3ed   :  { %1176 = vmatprep.subr.mxu1 %v3745_v52  ;;  %2890 = vmatprep.subr.mxu0 %v5215_v36 }
 0x3ee   :  { %1177 = vmatpush1.msra.mxu1 %v3751_v54  ;;  %2891 = vmatpush3.msra.mxu0 %v3907_v16 }
 0x3ef   :  { %1178 = vmatprep.subr.mxu1 %v3757_v56  ;;  %2892 = vmatprep.subr.mxu0 %v5215_v36 }
 0x3f0   :  { %1179 = vmatpush1.msra.mxu1 %v3763_v58  ;;  %2893 = vmatpush3.msra.mxu0 %v3916_v17 }
 0x3f1   :  { %1180 = vmatprep.subr.mxu1 %v3770_v59  ;;  %2894 = vmatprep.subr.mxu0 %v5215_v36 }
 0x3f2   :  { %1181 = vmatpush1.msra.mxu1 %v3776_v60  ;;  %2895 = vmatpush3.msra.mxu0 %v3925_v18 }
 0x3f3   :  { %1182 = vmatprep.subr.mxu1 %v3782_v61  ;;  %2896 = vmatprep.subr.mxu0 %v5215_v36 }
 0x3f4   :  { %1183 = vmatpush1.msra.mxu1 %v3788_v62  ;;  %2897 = vmatpush3.msra.mxu0 %v3934_v19 }
 0x3f5   :  { %1184 = vmatprep.subr.mxu1 %v3800_v0  ;;  %2898 = vmatprep.subr.mxu0 %v5215_v36 }
 0x3f6   :  { %1185 = vmatpush1.msra.mxu1 %v3806_v1  ;;  %2899 = vmatpush3.msra.mxu0 %v3943_v20 }
 0x3f7   :  { %1186 = vmatprep.subr.mxu1 %v3813_v2  ;;  %2900 = vmatprep.subr.mxu0 %v5215_v36 }
 0x3f8   :  { %1187 = vmatpush1.msra.mxu1 %v3820_v3  ;;  %2901 = vmatpush3.msra.mxu0 %v3952_v21 }
 0x3f9   :  { %1188 = vmatprep.subr.mxu1 %v3832_v5  ;;  %2902 = vmatprep.subr.mxu0 %v5215_v36 }
 0x3fa   :  { %1189 = vmatpush1.msra.mxu1 %v3838_v6  ;;  %2903 = vmatpush3.msra.mxu0 %v3961_v22 }
 0x3fb   :  { %1190 = vmatprep.subr.mxu1 %v3845_v7  ;;  %2904 = vmatprep.subr.mxu0 %v5215_v36 }
 0x3fc   :  { %1191 = vmatpush1.msra.mxu1 %v5216_v53  ;;  %2905 = vmatpush3.msra.mxu0 %v5217_v12 }
 0x3fd   :  { %1192 = vmatprep.subr.mxu1 %v5218_v25  ;;  %2906 = vmatprep.subr.mxu0 %v5215_v36 }
 0x3fe   :  { %1193 = vmatpush1.msra.mxu1 %v5229_v46  ;;  %2907 = vmatpush3.msra.mxu0 %v5230_v13 }
 0x3ff   :  { %1194 = vmatprep.subr.mxu1 %v5231_v11  ;;  %2908 = vmatprep.subr.mxu0 %v5215_v36 }
 0x400   :  { %1195 = vmatpush1.msra.mxu1 %v5232_v38  ;;  %1228 = vmatprep.mubr.f32.mxu1 %v5215_v36 }
 0x401   :  { %2909 = vmatpush3.msra.mxu0 %v5233_v28  ;;  %2910 = vmatprep.mubr.msk.f32.mxu0 %vm3324_vm1, %v5215_v36 }
 0x402   :  { %1327 = vmatprep.subr.mxu1 %v5234_v45  ;;  %2913 = vmatprep.subr.mxu0 %v5215_v36 }
 0x4a1   :  { %v1067_v26 = vpop.f32.mrf.mxu1  ;;  %v1138_v10 = vpop.f32.mrf.mxu0 }
 0x4a2   :  { %v1068_v24 = vadd.f32 %v1067_v26, %v5235_v55  ;;  %v1139_v46 = vadd.f32 %v1138_v10, %v4121_v50  ;;  %v4397_v10 = vld [vmem:[%s5133_s5 + $0x160] sm:$0xff] }
 0x4a3   :  { %v1069_v48 = vpop.f32.mrf.mxu1  ;;  %v2877_v31 = vpop.f32.mrf.mxu0 }
 0x4a4   :  { %v1142_v23 = vadd.f32 %v1068_v24, %v5236_v57  ;;  %v1070_v32 = vadd.f32 %v1069_v48, %v4116_v27  ;;  %v5238_v31 = vld [vmem:[#allocation15_spill] sm:$0xff] }
 0x4a6   :  { %v2373_v42 = vmul.f32 -1.442695, %v1142_v23  ;;  %v1149_v29 = vadd.f32 %v1070_v32, %v5237_v8  ;;  %v4410_v32 = vld [vmem:[%s5133_s5 + $0x138] sm:$0xff]  ;;  %v4416_v8 = vld [vmem:[%s5133_s5 + $0x148] sm:$0xff] }
 0x4a8   :  { %3215 = vpow2.f32 %v2373_v42  ;;  %v2374_v28 = vmul.f32 -1.442695, %v1149_v29 }
 0x4aa   :  { %3217 = vpow2.f32 %v2374_v28 }
 0x4b5   :  { %v3216_v38 = vpop.eup %3215 }
 0x4b6   :  { %v1146_v45 = vadd.f32 1.0, %v3216_v38  ;;  %v4391_v38 = vld [vmem:[%s5133_s5 + $0x150] sm:$0xff] }
 0x4b7   :  { %v3218_v11 = vpop.eup %3217 }
 0x4b8   :  { %3219 = vrcp.f32 %v1146_v45  ;;  %v1153_v13 = vadd.f32 1.0, %v3218_v11  ;;  %v4384_v11 = vld [vmem:[%s5133_s5 + $0x158] sm:$0xff]  ;;  %v4422_v45 = vld [vmem:[%s5133_s5 + $0x128] sm:$0xff] }
 0x4ba   :  { %3221 = vrcp.f32 %v1153_v13  ;;  %v4378_v13 = vld [vmem:[%s5133_s5 + $0x178] sm:$0xff] }
 0x4c5   :  { %v3220_v26 = vpop.eup %3219 }
 0x4c6   :  { %v1156_v55 = vmul.f32 %v3220_v26, %v1139_v46  ;;  %v4372_v46 = vld [vmem:[%s5133_s5 + $0x168] sm:$0xff]  ;;  %v4429_v26 = vld [vmem:[%s5133_s5 + $0x120] sm:$0xff] }
 0x4c7   :  { %v3222_v57 = vpop.eup %3221 }
 0x4c8   :  { %v1157_v24 = vadd.f32 %v1156_v55, %v5238_v31  ;;  %v1159_v48 = vsub.f32 1.0, %v3222_v57  ;;  %v1161_v29 = vmul.f32 %v3222_v57, %v4204_v39  ;;  %v4403_v55 = vld [vmem:[%s5133_s5 + $0x140] sm:$0xff]  ;;  %v4435_v31 = vld [vmem:[%s5133_s5 + $0x130] sm:$0xff]  ;;  %v4448_v57 = vld [vmem:[%s5133_s5 + $0x108] sm:$0xff] }
 0x4ca   :  { %3223 = vtanh.f32 %v1157_v24  ;;  %v4441_v24 = vld [vmem:[%s5133_s5 + $0x110] sm:$0xff] }
 0x4d7   :  { %v3224_v23 = vpop.eup %3223 }
 0x4d8   :  { %v1160_v42 = vmul.f32 %v3224_v23, %v1159_v48  ;;  %v4454_v48 = vld [vmem:[%s5133_s5 + $0x118] sm:$0xff] }
 0x4d9   :  { %v4460_v23 = vld [vmem:[%s5133_s5 + $0xf8] sm:$0xff] }
 0x4da   :  { %v4282_v28 = vadd.f32 %v1161_v29, %v1160_v42  ;;  %v4467_v42 = vld [vmem:[%s5133_s5 + $0xf0] sm:$0xff]  ;;  %v4473_v29 = vld [vmem:[%s5133_s5 + $0x100] sm:$0xff] }
 0x4dc   :  { %5239 = vst [vmem:[#allocation8_spill] sm:$0xff] %v4282_v28  ;;  %1229 = vmatmul.mubr.f32.vlgmr.msra.gmra.mxu1 %v4282_v28  ;;  %2911 = vmatmul.mubr.f32.vlgmr.msra.gmra.mxu0 %v4282_v28 }
 0x4dd   :  { %1328 = vmatpush1.msra.mxu1 %v3672_v30  ;;  %2914 = vmatpush3.msra.mxu0 %v3687_v35  ;;  %v5240_v30 = vld [vmem:[#allocation5_spill] sm:$0xff]  ;;  %v5243_v35 = vld [vmem:[#allocation7_spill] sm:$0xff] }
 0x4de   :  { %1329 = vmatprep.subr.mxu1 %v3677_v33  ;;  %2915 = vmatprep.subr.mxu0 %v5215_v36  ;;  %v5241_v33 = vld [vmem:[#allocation9_spill] sm:$0xff] }
 0x4df   :  { %1330 = vmatpush1.msra.mxu1 %v3682_v34  ;;  %2916 = vmatpush3.msra.mxu0 %v3793_v63  ;;  %v5242_v34 = vld [vmem:[#allocation6_spill] sm:$0xff] }
 0x4e0   :  { %1331 = vmatprep.subr.mxu1 %v3693_v37  ;;  %2917 = vmatprep.subr.mxu0 %v5215_v36  ;;  %v5244_v37 = vld [vmem:[#allocation10_spill] sm:$0xff] }
 0x4e1   :  { %1332 = vmatpush1.msra.mxu1 %v3700_v40  ;;  %2918 = vmatpush3.msra.mxu0 %v3825_v4  ;;  %v4354_v40 = vld [vmem:[%s5133_s5 + $0x170] sm:$0xff] }
 0x4e2   :  { %1333 = vmatprep.subr.mxu1 %v3706_v41  ;;  %2919 = vmatprep.subr.mxu0 %v5215_v36 }
 0x4e3   :  { %1334 = vmatpush1.msra.mxu1 %v3713_v43  ;;  %2920 = vmatpush3.msra.mxu0 %v3857_v9 }
 0x4e4   :  { %1335 = vmatprep.subr.mxu1 %v3719_v44  ;;  %2921 = vmatprep.subr.mxu0 %v5215_v36  ;;  %v5245_v44 = vld [vmem:[#allocation31_spill] sm:$0xff] }
 0x4e5   :  { %1336 = vmatpush1.msra.mxu1 %v3725_v47  ;;  %2922 = vmatpush3.msra.mxu0 %v3889_v14 }
 0x4e6   :  { %1337 = vmatprep.subr.mxu1 %v3732_v49  ;;  %2923 = vmatprep.subr.mxu0 %v5215_v36 }
 0x4e7   :  { %1338 = vmatpush1.msra.mxu1 %v3738_v51  ;;  %2924 = vmatpush3.msra.mxu0 %v3898_v15 }
 0x4e8   :  { %1339 = vmatprep.subr.mxu1 %v3745_v52  ;;  %2925 = vmatprep.subr.mxu0 %v5215_v36  ;;  %v5246_v52 = vld [vmem:[#allocation19_spill] sm:$0xff] }
 0x4e9   :  { %1340 = vmatpush1.msra.mxu1 %v3751_v54  ;;  %2926 = vmatpush3.msra.mxu0 %v3907_v16 }
 0x4ea   :  { %1341 = vmatprep.subr.mxu1 %v3757_v56  ;;  %2927 = vmatprep.subr.mxu0 %v5215_v36 }
 0x4eb   :  { %1342 = vmatpush1.msra.mxu1 %v3763_v58  ;;  %2928 = vmatpush3.msra.mxu0 %v3916_v17 }
 0x4ec   :  { %1343 = vmatprep.subr.mxu1 %v3770_v59  ;;  %2929 = vmatprep.subr.mxu0 %v5215_v36  ;;  %v5247_v59 = vld [vmem:[#allocation21_spill] sm:$0xff] }
 0x4ed   :  { %1344 = vmatpush1.msra.mxu1 %v3776_v60  ;;  %2930 = vmatpush3.msra.mxu0 %v3925_v18 }
 0x4ee   :  { %1345 = vmatprep.subr.mxu1 %v3782_v61  ;;  %2931 = vmatprep.subr.mxu0 %v5215_v36 }
 0x4ef   :  { %1346 = vmatpush1.msra.mxu1 %v3788_v62  ;;  %2932 = vmatpush3.msra.mxu0 %v3934_v19 }
 0x4f0   :  { %1347 = vmatprep.subr.mxu1 %v3800_v0  ;;  %2933 = vmatprep.subr.mxu0 %v5215_v36 }
 0x4f1   :  { %1348 = vmatpush1.msra.mxu1 %v3806_v1  ;;  %2934 = vmatpush3.msra.mxu0 %v3943_v20 }
 0x4f2   :  { %1349 = vmatprep.subr.mxu1 %v3813_v2  ;;  %2935 = vmatprep.subr.mxu0 %v5215_v36 }
 0x4f3   :  { %1350 = vmatpush1.msra.mxu1 %v3820_v3  ;;  %2936 = vmatpush3.msra.mxu0 %v3952_v21 }
 0x4f4   :  { %1351 = vmatprep.subr.mxu1 %v3832_v5  ;;  %2937 = vmatprep.subr.mxu0 %v5215_v36  ;;  %v5248_v5 = vld [vmem:[#allocation13_spill] sm:$0xff] }
 0x4f5   :  { %1352 = vmatpush1.msra.mxu1 %v3838_v6  ;;  %2938 = vmatpush3.msra.mxu0 %v3961_v22 }
 0x4f6   :  { %1353 = vmatprep.subr.mxu1 %v3845_v7  ;;  %2939 = vmatprep.subr.mxu0 %v5215_v36 }
 0x4f7   :  { %1354 = vmatpush1.msra.mxu1 %v5216_v53  ;;  %2940 = vmatpush3.msra.mxu0 %v5217_v12 }
 0x4f8   :  { %1355 = vmatprep.subr.mxu1 %v5218_v25  ;;  %2941 = vmatprep.subr.mxu0 %v5215_v36 }
 0x4f9   :  { %1356 = vmatpush1.msra.mxu1 %v5240_v30  ;;  %2942 = vmatpush3.msra.mxu0 %v5241_v33  ;;  %v4479_v30 = vld [vmem:[%s5133_s5 + $0xe0] sm:$0xff] }
 0x4fa   :  { %1357 = vmatprep.subr.mxu1 %v5242_v34  ;;  %2943 = vmatprep.subr.mxu0 %v5215_v36  ;;  %v4486_v34 = vld [vmem:[%s5133_s5 + $0xd8] sm:$0xff] }
 0x4fb   :  { %1358 = vmatpush1.msra.mxu1 %v5243_v35  ;;  %1391 = vmatprep.mubr.f32.mxu1 %v5215_v36  ;;  %v4493_v35 = vld [vmem:[%s5133_s5 + $0xc8] sm:$0xff] }
 0x4fc   :  { %2944 = vmatpush3.msra.mxu0 %v5244_v37  ;;  %2945 = vmatprep.mubr.msk.f32.mxu0 %vm3324_vm1, %v5215_v36 }
 0x4fd   :  { %1490 = vmatprep.subr.mxu1 %v4354_v40  ;;  %2948 = vmatprep.subr.mxu0 %v5215_v36 }
 0x59c   :  { %v1230_v41 = vpop.f32.mrf.mxu1  ;;  %v1301_v43 = vpop.f32.mrf.mxu0 }
 0x59d   :  { %v1231_v47 = vadd.f32 %v1230_v41, %v5245_v44  ;;  %v1302_v2 = vadd.f32 %v1301_v43, %v4121_v50  ;;  %v4500_v41 = vld [vmem:[%s5133_s5 + $0xc0] sm:$0xff]  ;;  %v4514_v43 = vld [vmem:[%s5133_s5 + $0xa8] sm:$0xff] }
 0x59e   :  { %v1232_v49 = vpop.f32.mrf.mxu1  ;;  %v2912_v51 = vpop.f32.mrf.mxu0 }
 0x59f   :  { %v1305_v54 = vadd.f32 %v1231_v47, %v5246_v52  ;;  %v1233_v58 = vadd.f32 %v1232_v49, %v4116_v27  ;;  %v4528_v47 = vld [vmem:[%s5133_s5 + $0x90] sm:$0xff]  ;;  %v4542_v49 = vld [vmem:[%s5133_s5 + $0x78] sm:$0xff]  ;;  %v4556_v51 = vld [vmem:[%s5133_s5 + $0x60] sm:$0xff] }
 0x5a0   :  { %v4570_v52 = vld [vmem:[%s5133_s5 + $0x48] sm:$0xff] }
 0x5a1   :  { %v2375_v56 = vmul.f32 -1.442695, %v1305_v54  ;;  %v1312_v60 = vadd.f32 %v1233_v58, %v5247_v59  ;;  %v4584_v54 = vld [vmem:[%s5133_s5 + $0x30] sm:$0xff]  ;;  %v4612_v58 = vld [vmem:[%s5133_s5] sm:$0xff] }
 0x5a2   :  { %5252 = vst [vmem:[#allocation11_spill] sm:$0xff] %v4612_v58 }
 0x5a3   :  { %3225 = vpow2.f32 %v2375_v56  ;;  %v2376_v61 = vmul.f32 -1.442695, %v1312_v60  ;;  %v4598_v56 = vld [vmem:[%s5133_s5 + $0x18] sm:$0xff] }
 0x5a4   :  { %5250 = vst [vmem:[#allocation12_spill] sm:$0xff] %v4598_v56 }
 0x5a5   :  { %3227 = vpow2.f32 %v2376_v61 }
 0x5b0   :  { %v3226_v62 = vpop.eup %3225 }
 0x5b1   :  { %v1309_v63 = vadd.f32 1.0, %v3226_v62 }
 0x5b2   :  { %v3228_v0 = vpop.eup %3227 }
 0x5b3   :  { %3229 = vrcp.f32 %v1309_v63  ;;  %v1316_v1 = vadd.f32 1.0, %v3228_v0  ;;  %v5253_v63 = vld [vmem:[#allocation23_spill] sm:$0xff] }
 0x5b5   :  { %3231 = vrcp.f32 %v1316_v1 }
 0x5c0   :  { %v3230_v3 = vpop.eup %3229 }
 0x5c1   :  { %v1319_v4 = vmul.f32 %v3230_v3, %v1302_v2 }
 0x5c2   :  { %v3232_v7 = vpop.eup %3231 }
 0x5c3   :  { %v1320_v6 = vadd.f32 %v1319_v4, %v5248_v5  ;;  %v1322_v9 = vsub.f32 1.0, %v3232_v7  ;;  %v1324_v53 = vmul.f32 %v3232_v7, %v4282_v28  ;;  %v5259_v28 = vld [vmem:[#allocation27_spill] sm:$0xff] }
 0x5c5   :  { %3233 = vtanh.f32 %v1320_v6 }
 0x5d2   :  { %v3234_v14 = vpop.eup %3233 }
 0x5d3   :  { %v1323_v15 = vmul.f32 %v3234_v14, %v1322_v9 }
 0x5d5   :  { %v4365_v25 = vadd.f32 %v1324_v53, %v1323_v15 }
 0x5d7   :  { %5249 = vst [vmem:[#allocation4_spill] sm:$0xff] %v4365_v25  ;;  %1392 = vmatmul.mubr.f32.vlgmr.msra.gmra.mxu1 %v4365_v25  ;;  %2946 = vmatmul.mubr.f32.vlgmr.msra.gmra.mxu0 %v4365_v25 }
 0x5d8   :  { %1491 = vmatpush1.msra.mxu1 %v4372_v46  ;;  %2949 = vmatpush3.msra.mxu0 %v4378_v13 }
 0x5d9   :  { %1492 = vmatprep.subr.mxu1 %v4384_v11  ;;  %2950 = vmatprep.subr.mxu0 %v5215_v36 }
 0x5da   :  { %1493 = vmatpush1.msra.mxu1 %v4391_v38  ;;  %2951 = vmatpush3.msra.mxu0 %v4397_v10 }
 0x5db   :  { %1494 = vmatprep.subr.mxu1 %v4403_v55  ;;  %2952 = vmatprep.subr.mxu0 %v5215_v36 }
 0x5dc   :  { %1495 = vmatpush1.msra.mxu1 %v4410_v32  ;;  %2953 = vmatpush3.msra.mxu0 %v4416_v8 }
 0x5dd   :  { %1496 = vmatprep.subr.mxu1 %v4422_v45  ;;  %2954 = vmatprep.subr.mxu0 %v5215_v36 }
 0x5de   :  { %1497 = vmatpush1.msra.mxu1 %v4429_v26  ;;  %2955 = vmatpush3.msra.mxu0 %v4435_v31 }
 0x5df   :  { %1498 = vmatprep.subr.mxu1 %v4441_v24  ;;  %2956 = vmatprep.subr.mxu0 %v5215_v36 }
 0x5e0   :  { %1499 = vmatpush1.msra.mxu1 %v4448_v57  ;;  %2957 = vmatpush3.msra.mxu0 %v4454_v48 }
 0x5e1   :  { %1500 = vmatprep.subr.mxu1 %v4460_v23  ;;  %2958 = vmatprep.subr.mxu0 %v5215_v36 }
 0x5e2   :  { %1501 = vmatpush1.msra.mxu1 %v4467_v42  ;;  %2959 = vmatpush3.msra.mxu0 %v4473_v29 }
 0x5e3   :  { %1502 = vmatprep.subr.mxu1 %v4479_v30  ;;  %2960 = vmatprep.subr.mxu0 %v5215_v36 }
 0x5e4   :  { %1503 = vmatpush1.msra.mxu1 %v4486_v34  ;;  %2961 = vmatpush3.msra.mxu0 %v3907_v16  ;;  %v4507_v16 = vld [vmem:[%s5133_s5 + $0xb0] sm:$0xff] }
 0x5e5   :  { %1504 = vmatprep.subr.mxu1 %v4493_v35  ;;  %2962 = vmatprep.subr.mxu0 %v5215_v36 }
 0x5e6   :  { %1505 = vmatpush1.msra.mxu1 %v4500_v41  ;;  %2963 = vmatpush3.msra.mxu0 %v3916_v17  ;;  %v4521_v17 = vld [vmem:[%s5133_s5 + $0x98] sm:$0xff] }
 0x5e7   :  { %1506 = vmatprep.subr.mxu1 %v4507_v16  ;;  %2964 = vmatprep.subr.mxu0 %v5215_v36 }
 0x5e8   :  { %1507 = vmatpush1.msra.mxu1 %v4514_v43  ;;  %2965 = vmatpush3.msra.mxu0 %v3925_v18  ;;  %v4535_v18 = vld [vmem:[%s5133_s5 + $0x80] sm:$0xff] }
 0x5e9   :  { %1508 = vmatprep.subr.mxu1 %v4521_v17  ;;  %2966 = vmatprep.subr.mxu0 %v5215_v36 }
 0x5ea   :  { %1509 = vmatpush1.msra.mxu1 %v4528_v47  ;;  %2967 = vmatpush3.msra.mxu0 %v3934_v19  ;;  %v4549_v19 = vld [vmem:[%s5133_s5 + $0x68] sm:$0xff] }
 0x5eb   :  { %1510 = vmatprep.subr.mxu1 %v4535_v18  ;;  %2968 = vmatprep.subr.mxu0 %v5215_v36 }
 0x5ec   :  { %1511 = vmatpush1.msra.mxu1 %v4542_v49  ;;  %2969 = vmatpush3.msra.mxu0 %v3943_v20  ;;  %v4563_v20 = vld [vmem:[%s5133_s5 + $0x50] sm:$0xff] }
 0x5ed   :  { %1512 = vmatprep.subr.mxu1 %v4549_v19  ;;  %2970 = vmatprep.subr.mxu0 %v5215_v36 }
 0x5ee   :  { %1513 = vmatpush1.msra.mxu1 %v4556_v51  ;;  %2971 = vmatpush3.msra.mxu0 %v3952_v21  ;;  %v4577_v21 = vld [vmem:[%s5133_s5 + $0x38] sm:$0xff] }
 0x5ef   :  { %1514 = vmatprep.subr.mxu1 %v4563_v20  ;;  %2972 = vmatprep.subr.mxu0 %v5215_v36 }
 0x5f0   :  { %1515 = vmatpush1.msra.mxu1 %v4570_v52  ;;  %2973 = vmatpush3.msra.mxu0 %v3961_v22  ;;  %v4591_v22 = vld [vmem:[%s5133_s5 + $0x20] sm:$0xff] }
 0x5f1   :  { %1516 = vmatprep.subr.mxu1 %v4577_v21  ;;  %2974 = vmatprep.subr.mxu0 %v5215_v36 }
 0x5f2   :  { %1517 = vmatpush1.msra.mxu1 %v4584_v54  ;;  %2975 = vmatpush3.msra.mxu0 %v5217_v12  ;;  %v4605_v12 = vld [vmem:[%s5133_s5 + $0x8] sm:$0xff] }
 0x5f3   :  { %1518 = vmatprep.subr.mxu1 %v4591_v22  ;;  %2976 = vmatprep.subr.mxu0 %v5215_v36  ;;  %5251 = vst [vmem:[#allocation14_spill] sm:$0xff] %v4605_v12 }
 0x5f4   :  { %1519 = vmatpush1.msra.mxu1 %v4598_v56  ;;  %2977 = vmatpush3.msra.mxu0 %v5241_v33 }
 0x5f5   :  { %1520 = vmatprep.subr.mxu1 %v4605_v12  ;;  %2978 = vmatprep.subr.mxu0 %v5215_v36 }
 0x5f6   :  { %1521 = vmatpush1.msra.mxu1 %v4612_v58  ;;  %1554 = vmatprep.mubr.f32.mxu1 %v5215_v36 }
 0x5f7   :  { %2979 = vmatpush3.msra.mxu0 %v5244_v37  ;;  %2980 = vmatprep.mubr.msk.f32.mxu0 %vm3324_vm1, %v5215_v36  ;;  %v5254_v37 = vld [vmem:[#allocation25_spill] sm:$0xff] }
 0x5f8   :  { %1653 = vmatprep.subr.mxu1 %v4354_v40  ;;  %2983 = vmatprep.subr.mxu0 %v5215_v36 }
 0x697   :  { %v1393_v33 = vpop.f32.mrf.mxu1  ;;  %v1464_v59 = vpop.f32.mrf.mxu0 }
 0x698   :  { %v1394_v60 = vadd.f32 %v1393_v33, %v5245_v44  ;;  %v1465_v14 = vadd.f32 %v1464_v59, %v4121_v50  ;;  %v5255_v33 = vld [vmem:[#allocation20_spill] sm:$0xff]  ;;  %v4660_v59 = vld [vmem:[%s5133_s5 + $0xe8] sm:$0xff] }
 0x699   :  { %v1395_v61 = vpop.f32.mrf.mxu1  ;;  %v2947_v62 = vpop.f32.mrf.mxu0 }
 0x69a   :  { %v1468_v0 = vadd.f32 %v1394_v60, %v5253_v63  ;;  %v1396_v2 = vadd.f32 %v1395_v61, %v4116_v27 }
 0x69c   :  { %v2377_v1 = vmul.f32 -1.442695, %v1468_v0  ;;  %v1475_v3 = vadd.f32 %v1396_v2, %v5254_v37  ;;  %v4669_v37 = vld [vmem:[%s5133_s5 + $0xd0] sm:$0xff] }
 0x69e   :  { %3235 = vpow2.f32 %v2377_v1  ;;  %v2378_v4 = vmul.f32 -1.442695, %v1475_v3  ;;  %v4678_v3 = vld [vmem:[%s5133_s5 + $0xb8] sm:$0xff] }
 0x6a0   :  { %3237 = vpow2.f32 %v2378_v4  ;;  %v4687_v4 = vld [vmem:[%s5133_s5 + $0xa0] sm:$0xff] }
 0x6ab   :  { %v3236_v5 = vpop.eup %3235 }
 0x6ac   :  { %v1472_v6 = vadd.f32 1.0, %v3236_v5  ;;  %v4696_v5 = vld [vmem:[%s5133_s5 + $0x88] sm:$0xff] }
 0x6ad   :  { %v3238_v7 = vpop.eup %3237 }
 0x6ae   :  { %3239 = vrcp.f32 %v1472_v6  ;;  %v1479_v9 = vadd.f32 1.0, %v3238_v7  ;;  %v4705_v6 = vld [vmem:[%s5133_s5 + $0x70] sm:$0xff]  ;;  %v4714_v7 = vld [vmem:[%s5133_s5 + $0x58] sm:$0xff] }
 0x6b0   :  { %3241 = vrcp.f32 %v1479_v9  ;;  %v4723_v9 = vld [vmem:[%s5133_s5 + $0x40] sm:$0xff] }
 0x6bb   :  { %v3240_v15 = vpop.eup %3239 }
 0x6bc   :  { %v1482_v53 = vmul.f32 %v3240_v15, %v1465_v14  ;;  %v4732_v14 = vld [vmem:[%s5133_s5 + $0x28] sm:$0xff]  ;;  %v4742_v15 = vld [vmem:[%s5133_s5 + $0x10] sm:$0xff] }
 0x6bd   :  { %v3242_v62 = vpop.eup %3241  ;;  %5256 = vst [vmem:[#allocation2_spill] sm:$0xff] %v4732_v14  ;;  %5257 = vst [vmem:[#allocation16_spill] sm:$0xff] %v4742_v15 }
 0x6be   :  { %v1483_v60 = vadd.f32 %v1482_v53, %v5255_v33  ;;  %v1485_v61 = vsub.f32 1.0, %v3242_v62  ;;  %v1487_v1 = vmul.f32 %v3242_v62, %v4365_v25 }
 0x6c0   :  { %3243 = vtanh.f32 %v1483_v60 }
 0x6cd   :  { %v3244_v63 = vpop.eup %3243 }
 0x6ce   :  { %v1486_v0 = vmul.f32 %v3244_v63, %v1485_v61  ;;  %v5258_v63 = vld [vmem:[#allocation26_spill] sm:$0xff] }
 0x6d0   :  { %v4628_v2 = vadd.f32 %v1487_v1, %v1486_v0 }
 0x6d2   :  { %1555 = vmatmul.mubr.f32.vlgmr.msra.gmra.mxu1 %v4628_v2  ;;  %2981 = vmatmul.mubr.f32.vlgmr.msra.gmra.mxu0 %v4628_v2 }
 0x6d3   :  { %1654 = vmatpush1.msra.mxu1 %v4372_v46  ;;  %2984 = vmatpush3.msra.mxu0 %v4378_v13 }
 0x6d4   :  { %1655 = vmatprep.subr.mxu1 %v4384_v11  ;;  %2985 = vmatprep.subr.mxu0 %v5215_v36 }
 0x6d5   :  { %1656 = vmatpush1.msra.mxu1 %v4391_v38  ;;  %2986 = vmatpush3.msra.mxu0 %v4397_v10 }
 0x6d6   :  { %1657 = vmatprep.subr.mxu1 %v4403_v55  ;;  %2987 = vmatprep.subr.mxu0 %v5215_v36 }
 0x6d7   :  { %1658 = vmatpush1.msra.mxu1 %v4410_v32  ;;  %2988 = vmatpush3.msra.mxu0 %v4416_v8 }
 0x6d8   :  { %1659 = vmatprep.subr.mxu1 %v4422_v45  ;;  %2989 = vmatprep.subr.mxu0 %v5215_v36 }
 0x6d9   :  { %1660 = vmatpush1.msra.mxu1 %v4429_v26  ;;  %2990 = vmatpush3.msra.mxu0 %v4435_v31 }
 0x6da   :  { %1661 = vmatprep.subr.mxu1 %v4441_v24  ;;  %2991 = vmatprep.subr.mxu0 %v5215_v36 }
 0x6db   :  { %1662 = vmatpush1.msra.mxu1 %v4448_v57  ;;  %2992 = vmatpush3.msra.mxu0 %v4454_v48 }
 0x6dc   :  { %1663 = vmatprep.subr.mxu1 %v4460_v23  ;;  %2993 = vmatprep.subr.mxu0 %v5215_v36 }
 0x6dd   :  { %1664 = vmatpush1.msra.mxu1 %v4467_v42  ;;  %2994 = vmatpush3.msra.mxu0 %v4473_v29 }
 0x6de   :  { %1665 = vmatprep.subr.mxu1 %v4479_v30  ;;  %2995 = vmatprep.subr.mxu0 %v5215_v36 }
 0x6df   :  { %1666 = vmatpush1.msra.mxu1 %v4486_v34  ;;  %2996 = vmatpush3.msra.mxu0 %v4660_v59 }
 0x6e0   :  { %1667 = vmatprep.subr.mxu1 %v4493_v35  ;;  %2997 = vmatprep.subr.mxu0 %v5215_v36 }
 0x6e1   :  { %1668 = vmatpush1.msra.mxu1 %v4500_v41  ;;  %2998 = vmatpush3.msra.mxu0 %v4669_v37 }
 0x6e2   :  { %1669 = vmatprep.subr.mxu1 %v4507_v16  ;;  %2999 = vmatprep.subr.mxu0 %v5215_v36 }
 0x6e3   :  { %1670 = vmatpush1.msra.mxu1 %v4514_v43  ;;  %3000 = vmatpush3.msra.mxu0 %v4678_v3 }
 0x6e4   :  { %1671 = vmatprep.subr.mxu1 %v4521_v17  ;;  %3001 = vmatprep.subr.mxu0 %v5215_v36 }
 0x6e5   :  { %1672 = vmatpush1.msra.mxu1 %v4528_v47  ;;  %3002 = vmatpush3.msra.mxu0 %v4687_v4 }
 0x6e6   :  { %1673 = vmatprep.subr.mxu1 %v4535_v18  ;;  %3003 = vmatprep.subr.mxu0 %v5215_v36 }
 0x6e7   :  { %1674 = vmatpush1.msra.mxu1 %v4542_v49  ;;  %3004 = vmatpush3.msra.mxu0 %v4696_v5 }
 0x6e8   :  { %1675 = vmatprep.subr.mxu1 %v4549_v19  ;;  %3005 = vmatprep.subr.mxu0 %v5215_v36 }
 0x6e9   :  { %1676 = vmatpush1.msra.mxu1 %v4556_v51  ;;  %3006 = vmatpush3.msra.mxu0 %v4705_v6 }
 0x6ea   :  { %1677 = vmatprep.subr.mxu1 %v4563_v20  ;;  %3007 = vmatprep.subr.mxu0 %v5215_v36 }
 0x6eb   :  { %1678 = vmatpush1.msra.mxu1 %v4570_v52  ;;  %3008 = vmatpush3.msra.mxu0 %v4714_v7 }
 0x6ec   :  { %1679 = vmatprep.subr.mxu1 %v4577_v21  ;;  %3009 = vmatprep.subr.mxu0 %v5215_v36 }
 0x6ed   :  { %1680 = vmatpush1.msra.mxu1 %v4584_v54  ;;  %3010 = vmatpush3.msra.mxu0 %v4723_v9 }
 0x6ee   :  { %1681 = vmatprep.subr.mxu1 %v4591_v22  ;;  %3011 = vmatprep.subr.mxu0 %v5215_v36 }
 0x6ef   :  { %1682 = vmatpush1.msra.mxu1 %v4598_v56  ;;  %3012 = vmatpush3.msra.mxu0 %v4732_v14 }
 0x6f0   :  { %1683 = vmatprep.subr.mxu1 %v4605_v12  ;;  %3013 = vmatprep.subr.mxu0 %v5215_v36 }
 0x6f1   :  { %1684 = vmatpush1.msra.mxu1 %v4612_v58  ;;  %1717 = vmatprep.mubr.f32.mxu1 %v5215_v36 }
 0x6f2   :  { %3014 = vmatpush3.msra.mxu0 %v4742_v15  ;;  %3015 = vmatprep.mubr.msk.f32.mxu0 %vm3324_vm1, %v5215_v36 }
 0x6f3   :  { %1816 = vmatprep.subr.mxu1 %v4354_v40  ;;  %3018 = vmatprep.subr.mxu0 %v5215_v36 }
 0x792   :  { %v1556_v53 = vpop.f32.mrf.mxu1  ;;  %v1627_v33 = vpop.f32.mrf.mxu0 }
 0x793   :  { %v1557_v60 = vadd.f32 %v1556_v53, %v5245_v44  ;;  %v1628_v56 = vadd.f32 %v1627_v33, %v4121_v50  ;;  %v2089_v33 = vld [vmem:[%s5138_s10 + $0x78] sm:$0xff] }
 0x794   :  { %v1558_v62 = vpop.f32.mrf.mxu1  ;;  %v2982_v61 = vpop.f32.mrf.mxu0 }
 0x795   :  { %v1631_v0 = vadd.f32 %v1557_v60, %v5258_v63  ;;  %v1559_v25 = vadd.f32 %v1558_v62, %v4116_v27  ;;  %v5260_v61 = vld [vmem:[#allocation18_spill] sm:$0xff] }
 0x797   :  { %v2379_v1 = vmul.f32 -1.442695, %v1631_v0  ;;  %v1638_v39 = vadd.f32 %v1559_v25, %v5259_v28  ;;  %v5262_v25 = vld [vmem:[#allocation2_spill] sm:$0xff] }
 0x799   :  { %3245 = vpow2.f32 %v2379_v1  ;;  %v2380_v15 = vmul.f32 -1.442695, %v1638_v39 }
 0x79b   :  { %3247 = vpow2.f32 %v2380_v15  ;;  %v1980_v15 = vld [vmem:[%s5137_s8] sm:$0xff] }
 0x7a6   :  { %v3246_v58 = vpop.eup %3245 }
 0x7a7   :  { %v1635_v40 = vadd.f32 1.0, %v3246_v58  ;;  %v1990_v58 = vld [vmem:[%s5137_s8 + $0x50] sm:$0xff] }
 0x7a8   :  { %v3248_v12 = vpop.eup %3247 }
 0x7a9   :  { %3249 = vrcp.f32 %v1635_v40  ;;  %v1642_v14 = vadd.f32 1.0, %v3248_v12  ;;  %v1991_v12 = vld [vmem:[%s5137_s8 + $0x58] sm:$0xff]  ;;  %v2088_v40 = vld [vmem:[%s5138_s10 + $0x70] sm:$0xff] }
 0x7ab   :  { %3251 = vrcp.f32 %v1642_v14  ;;  %v1981_v14 = vld [vmem:[%s5137_s8 + $0x8] sm:$0xff] }
 0x7b6   :  { %v3250_v53 = vpop.eup %3249 }
 0x7b7   :  { %v1645_v44 = vmul.f32 %v3250_v53, %v1628_v56  ;;  %v1992_v56 = vld [vmem:[%s5137_s8 + $0x60] sm:$0xff]  ;;  %v2087_v53 = vld [vmem:[%s5138_s10 + $0x68] sm:$0xff] }
 0x7b8   :  { %v3252_v63 = vpop.eup %3251 }
 0x7b9   :  { %v1646_v60 = vadd.f32 %v1645_v44, %v5260_v61  ;;  %v1648_v62 = vsub.f32 1.0, %v3252_v63  ;;  %v1650_v39 = vmul.f32 %v3252_v63, %v4628_v2  ;;  %v5261_v44 = vld [vmem:[#allocation12_spill] sm:$0xff]  ;;  %v2086_v61 = vld [vmem:[%s5138_s10 + $0x60] sm:$0xff] }
 0x7ba   :  { %v2084_v63 = vld [vmem:[%s5138_s10 + $0x50] sm:$0xff] }
 0x7bb   :  { %3253 = vtanh.f32 %v1646_v60  ;;  %v2085_v60 = vld [vmem:[%s5138_s10 + $0x58] sm:$0xff] }
 0x7c8   :  { %v3254_v0 = vpop.eup %3253 }
 0x7c9   :  { %v1649_v1 = vmul.f32 %v3254_v0, %v1648_v62  ;;  %v2083_v62 = vld [vmem:[%s5138_s10 + $0x48] sm:$0xff]  ;;  %v2082_v0 = vld [vmem:[%s5138_s10 + $0x40] sm:$0xff] }
 0x7cb   :  { %v4756_v28 = vadd.f32 %v1650_v39, %v1649_v1  ;;  %v2081_v1 = vld [vmem:[%s5138_s10 + $0x38] sm:$0xff]  ;;  %v2080_v39 = vld [vmem:[%s5138_s10 + $0x30] sm:$0xff] }
 0x7cd   :  { %1718 = vmatmul.mubr.f32.vlgmr.msra.gmra.mxu1 %v4756_v28  ;;  %3016 = vmatmul.mubr.f32.vlgmr.msra.gmra.mxu0 %v4756_v28 }
 0x7ce   :  { %1817 = vmatpush1.msra.mxu1 %v4372_v46  ;;  %3019 = vmatpush3.msra.mxu0 %v4378_v13  ;;  %v5263_v46 = vld [vmem:[#allocation14_spill] sm:$0xff]  ;;  %v5264_v13 = vld [vmem:[#allocation11_spill] sm:$0xff] }
 0x7cf   :  { %1818 = vmatprep.subr.mxu1 %v4384_v11  ;;  %3020 = vmatprep.subr.mxu0 %v5215_v36  ;;  %v5265_v11 = vld [vmem:[#allocation16_spill] sm:$0xff] }
 0x7d0   :  { %1819 = vmatpush1.msra.mxu1 %v4391_v38  ;;  %3021 = vmatpush3.msra.mxu0 %v4397_v10 }
 0x7d1   :  { %1820 = vmatprep.subr.mxu1 %v4403_v55  ;;  %3022 = vmatprep.subr.mxu0 %v5215_v36  ;;  %v5266_v55 = vld [vmem:[#allocation31_spill] sm:$0xff] }
 0x7d2   :  { %1821 = vmatpush1.msra.mxu1 %v4410_v32  ;;  %3023 = vmatpush3.msra.mxu0 %v4416_v8 }
 0x7d3   :  { %1822 = vmatprep.subr.mxu1 %v4422_v45  ;;  %3024 = vmatprep.subr.mxu0 %v5215_v36 }
 0x7d4   :  { %1823 = vmatpush1.msra.mxu1 %v4429_v26  ;;  %3025 = vmatpush3.msra.mxu0 %v4435_v31  ;;  %v5267_v26 = vld [vmem:[#allocation28_spill] sm:$0xff] }
 0x7d5   :  { %1824 = vmatprep.subr.mxu1 %v4441_v24  ;;  %3026 = vmatprep.subr.mxu0 %v5215_v36 }
 0x7d6   :  { %1825 = vmatpush1.msra.mxu1 %v4448_v57  ;;  %3027 = vmatpush3.msra.mxu0 %v4454_v48  ;;  %v5268_v48 = vld [vmem:[#allocation29_spill] sm:$0xff] }
 0x7d7   :  { %1826 = vmatprep.subr.mxu1 %v4460_v23  ;;  %3028 = vmatprep.subr.mxu0 %v5215_v36 }
 0x7d8   :  { %1827 = vmatpush1.msra.mxu1 %v4467_v42  ;;  %3029 = vmatpush3.msra.mxu0 %v4473_v29 }
 0x7d9   :  { %1828 = vmatprep.subr.mxu1 %v4479_v30  ;;  %3030 = vmatprep.subr.mxu0 %v5215_v36 }
 0x7da   :  { %1829 = vmatpush1.msra.mxu1 %v4486_v34  ;;  %3031 = vmatpush3.msra.mxu0 %v4660_v59  ;;  %v1989_v59 = vld [vmem:[%s5137_s8 + $0x48] sm:$0xff] }
 0x7db   :  { %1830 = vmatprep.subr.mxu1 %v4493_v35  ;;  %3032 = vmatprep.subr.mxu0 %v5215_v36 }
 0x7dc   :  { %1831 = vmatpush1.msra.mxu1 %v4500_v41  ;;  %3033 = vmatpush3.msra.mxu0 %v4669_v37  ;;  %v1988_v37 = vld [vmem:[%s5137_s8 + $0x40] sm:$0xff] }
 0x7dd   :  { %1832 = vmatprep.subr.mxu1 %v4507_v16  ;;  %3034 = vmatprep.subr.mxu0 %v5215_v36 }
 0x7de   :  { %1833 = vmatpush1.msra.mxu1 %v4514_v43  ;;  %3035 = vmatpush3.msra.mxu0 %v4678_v3  ;;  %v1987_v3 = vld [vmem:[%s5137_s8 + $0x38] sm:$0xff] }
 0x7df   :  { %1834 = vmatprep.subr.mxu1 %v4521_v17  ;;  %3036 = vmatprep.subr.mxu0 %v5215_v36  ;;  %v5269_v17 = vld [vmem:[#allocation24_spill] sm:$0xff] }
 0x7e0   :  { %1835 = vmatpush1.msra.mxu1 %v4528_v47  ;;  %3037 = vmatpush3.msra.mxu0 %v4687_v4  ;;  %v1986_v4 = vld [vmem:[%s5137_s8 + $0x30] sm:$0xff] }
 0x7e1   :  { %1836 = vmatprep.subr.mxu1 %v4535_v18  ;;  %3038 = vmatprep.subr.mxu0 %v5215_v36 }
 0x7e2   :  { %1837 = vmatpush1.msra.mxu1 %v4542_v49  ;;  %3039 = vmatpush3.msra.mxu0 %v4696_v5  ;;  %v1985_v5 = vld [vmem:[%s5137_s8 + $0x28] sm:$0xff] }
 0x7e3   :  { %1838 = vmatprep.subr.mxu1 %v4549_v19  ;;  %3040 = vmatprep.subr.mxu0 %v5215_v36 }
 0x7e4   :  { %1839 = vmatpush1.msra.mxu1 %v4556_v51  ;;  %3041 = vmatpush3.msra.mxu0 %v4705_v6  ;;  %v1984_v6 = vld [vmem:[%s5137_s8 + $0x20] sm:$0xff] }
 0x7e5   :  { %1840 = vmatprep.subr.mxu1 %v4563_v20  ;;  %3042 = vmatprep.subr.mxu0 %v5215_v36 }
 0x7e6   :  { %1841 = vmatpush1.msra.mxu1 %v4570_v52  ;;  %3043 = vmatpush3.msra.mxu0 %v4714_v7  ;;  %v1983_v7 = vld [vmem:[%s5137_s8 + $0x18] sm:$0xff] }
 0x7e7   :  { %1842 = vmatprep.subr.mxu1 %v4577_v21  ;;  %3044 = vmatprep.subr.mxu0 %v5215_v36  ;;  %v1995_v21 = vld [vmem:[%s5137_s8 + $0x78] sm:$0xff] }
 0x7e8   :  { %1843 = vmatpush1.msra.mxu1 %v4584_v54  ;;  %3045 = vmatpush3.msra.mxu0 %v4723_v9  ;;  %v1994_v54 = vld [vmem:[%s5137_s8 + $0x70] sm:$0xff] }
 0x7e9   :  { %1844 = vmatprep.subr.mxu1 %v4591_v22  ;;  %3046 = vmatprep.subr.mxu0 %v5215_v36  ;;  %v1993_v22 = vld [vmem:[%s5137_s8 + $0x68] sm:$0xff]  ;;  %v1982_v9 = vld [vmem:[%s5137_s8 + $0x10] sm:$0xff] }
 0x7ea   :  { %1845 = vmatpush1.msra.mxu1 %v5261_v44  ;;  %3047 = vmatpush3.msra.mxu0 %v5262_v25  ;;  %v2079_v44 = vld [vmem:[%s5138_s10 + $0x28] sm:$0xff]  ;;  %v2078_v25 = vld [vmem:[%s5138_s10 + $0x20] sm:$0xff] }
 0x7eb   :  { %1846 = vmatprep.subr.mxu1 %v5263_v46  ;;  %3048 = vmatprep.subr.mxu0 %v5215_v36  ;;  %v2077_v46 = vld [vmem:[%s5138_s10 + $0x18] sm:$0xff] }
 0x7ec   :  { %1847 = vmatpush1.msra.mxu1 %v5264_v13  ;;  %1880 = vmatprep.mubr.f32.mxu1 %v5215_v36 }
 0x7ed   :  { %3049 = vmatpush3.msra.mxu0 %v5265_v11  ;;  %3050 = vmatprep.mubr.msk.f32.mxu0 %vm3324_vm1, %v5215_v36 }
 0x7ee   :  { %3053 = vmatprep.subr.mxu1 %v5215_v36  ;;  %3088 = vmatprep.subr.mxu0 %v5215_v36 }
 0x88d   :  { %v1719_v38 = vpop.f32.mrf.mxu1  ;;  %v1790_v10 = vpop.f32.mrf.mxu0 }
 0x88e   :  { %v1720_v32 = vadd.f32 %v1719_v38, %v5266_v55  ;;  %v1791_v41 = vadd.f32 %v1790_v10, %v4121_v50 }
 0x88f   :  { %v1721_v8 = vpop.f32.mrf.mxu1  ;;  %v3017_v45 = vpop.f32.mrf.mxu0 }
 0x890   :  { %v1794_v31 = vadd.f32 %v1720_v32, %v5267_v26  ;;  %v1722_v57 = vadd.f32 %v1721_v8, %v4116_v27  ;;  %v5270_v8 = vld [vmem:[#allocation30_spill] sm:$0xff] }
 0x892   :  { %v2381_v24 = vmul.f32 -1.442695, %v1794_v31  ;;  %v1801_v23 = vadd.f32 %v1722_v57, %v5268_v48 }
 0x894   :  { %3255 = vpow2.f32 %v2381_v24  ;;  %v2382_v42 = vmul.f32 -1.442695, %v1801_v23  ;;  %v5271_v24 = vld [vmem:[#allocation32_spill] sm:$0xff] }
 0x896   :  { %3257 = vpow2.f32 %v2382_v42 }
 0x8a1   :  { %v3256_v29 = vpop.eup %3255 }
 0x8a2   :  { %v1798_v30 = vadd.f32 1.0, %v3256_v29 }
 0x8a3   :  { %v3258_v34 = vpop.eup %3257 }
 0x8a4   :  { %3259 = vrcp.f32 %v1798_v30  ;;  %v1805_v35 = vadd.f32 1.0, %v3258_v34 }
 0x8a6   :  { %3261 = vrcp.f32 %v1805_v35 }
 0x8b1   :  { %v3260_v16 = vpop.eup %3259 }
 0x8b2   :  { %v1808_v43 = vmul.f32 %v3260_v16, %v1791_v41  ;;  %v5272_v41 = vld [vmem:[#allocation22_spill] sm:$0xff] }
 0x8b3   :  { %v3262_v18 = vpop.eup %3261 }
 0x8b4   :  { %v1809_v47 = vadd.f32 %v1808_v43, %v5269_v17  ;;  %v1811_v49 = vsub.f32 1.0, %v3262_v18  ;;  %v1813_v20 = vmul.f32 %v3262_v18, %v4756_v28  ;;  %v5273_v43 = vld [vmem:[#allocation33_spill] sm:$0xff] }
 0x8b6   :  { %3263 = vtanh.f32 %v1809_v47  ;;  %v5275_v47 = vld [vmem:[#allocation8_spill] sm:$0xff] }
 0x8c3   :  { %v3264_v19 = vpop.eup %3263 }
 0x8c4   :  { %v1812_v51 = vmul.f32 %v3264_v19, %v1811_v49  ;;  %v5276_v19 = vld [vmem:[#allocation4_spill] sm:$0xff] }
 0x8c6   :  { %v4834_v52 = vadd.f32 %v1813_v20, %v1812_v51 }
 0x8c8   :  { %1881 = vmatmul.mubr.f32.vlgmr.msra.gmra.mxu1 %v4834_v52  ;;  %3051 = vmatmul.mubr.f32.vlgmr.msra.gmra.mxu0 %v4834_v52 }
 0x8c9   :  { %3085 = vmatprep.mubr.msk.f32.mxu1 %vm3324_vm1, %v5215_v36  ;;  %3120 = vmatprep.mubr.msk.f32.mxu0 %vm3324_vm1, %v5215_v36 }
 0x8ca   :  { %3054 = vmatpush3.msra.mxu1 %v1995_v21  ;;  %3089 = vmatpush3.msra.mxu0 %v2089_v33  ;;  %v2175_v33 = vld [vmem:[%s5139_s12 + $0x38] sm:$0xff] }
 0x8cb   :  { %3055 = vmatprep.subr.mxu1 %v5215_v36  ;;  %3090 = vmatprep.subr.mxu0 %v5215_v36 }
 0x8cc   :  { %3056 = vmatpush3.msra.mxu1 %v1994_v54  ;;  %3091 = vmatpush3.msra.mxu0 %v2088_v40  ;;  %v2174_v40 = vld [vmem:[%s5139_s12 + $0x30] sm:$0xff] }
 0x8cd   :  { %3057 = vmatprep.subr.mxu1 %v5215_v36  ;;  %3092 = vmatprep.subr.mxu0 %v5215_v36 }
 0x8ce   :  { %3058 = vmatpush3.msra.mxu1 %v1993_v22  ;;  %3093 = vmatpush3.msra.mxu0 %v2087_v53  ;;  %v2173_v53 = vld [vmem:[%s5139_s12 + $0x28] sm:$0xff] }
 0x8cf   :  { %3059 = vmatprep.subr.mxu1 %v5215_v36  ;;  %3094 = vmatprep.subr.mxu0 %v5215_v36 }
 0x8d0   :  { %3060 = vmatpush3.msra.mxu1 %v1992_v56  ;;  %3095 = vmatpush3.msra.mxu0 %v2086_v61  ;;  %v2172_v61 = vld [vmem:[%s5139_s12 + $0x20] sm:$0xff] }
 0x8d1   :  { %3061 = vmatprep.subr.mxu1 %v5215_v36  ;;  %3096 = vmatprep.subr.mxu0 %v5215_v36 }
 0x8d2   :  { %3062 = vmatpush3.msra.mxu1 %v1991_v12  ;;  %3097 = vmatpush3.msra.mxu0 %v2085_v60  ;;  %v2171_v60 = vld [vmem:[%s5139_s12 + $0x18] sm:$0xff] }
 0x8d3   :  { %3063 = vmatprep.subr.mxu1 %v5215_v36  ;;  %3098 = vmatprep.subr.mxu0 %v5215_v36 }
 0x8d4   :  { %3064 = vmatpush3.msra.mxu1 %v1990_v58  ;;  %3099 = vmatpush3.msra.mxu0 %v2084_v63  ;;  %v2385_v63 = vld [vmem:[%s5140_s9] ss:$0 sm:$0xff] }
 0x8d5   :  { %3065 = vmatprep.subr.mxu1 %v5215_v36  ;;  %3100 = vmatprep.subr.mxu0 %v5215_v36 }
 0x8d6   :  { %3066 = vmatpush3.msra.mxu1 %v1989_v59  ;;  %3101 = vmatpush3.msra.mxu0 %v2083_v62 }
 0x8d7   :  { %3067 = vmatprep.subr.mxu1 %v5215_v36  ;;  %3102 = vmatprep.subr.mxu0 %v5215_v36 }
 0x8d8   :  { %3068 = vmatpush3.msra.mxu1 %v1988_v37  ;;  %3103 = vmatpush3.msra.mxu0 %v2082_v0 }
 0x8d9   :  { %3069 = vmatprep.subr.mxu1 %v5215_v36  ;;  %3104 = vmatprep.subr.mxu0 %v5215_v36 }
 0x8da   :  { %3070 = vmatpush3.msra.mxu1 %v1987_v3  ;;  %3105 = vmatpush3.msra.mxu0 %v2081_v1  ;;  %v2183_v3 = vld [vmem:[%s5139_s12 + $0x78] sm:$0xff] }
 0x8db   :  { %3071 = vmatprep.subr.mxu1 %v5215_v36  ;;  %3106 = vmatprep.subr.mxu0 %v5215_v36 }
 0x8dc   :  { %3072 = vmatpush3.msra.mxu1 %v1986_v4  ;;  %3107 = vmatpush3.msra.mxu0 %v2080_v39  ;;  %v2182_v4 = vld [vmem:[%s5139_s12 + $0x70] sm:$0xff] }
 0x8dd   :  { %3073 = vmatprep.subr.mxu1 %v5215_v36  ;;  %3108 = vmatprep.subr.mxu0 %v5215_v36 }
 0x8de   :  { %3074 = vmatpush3.msra.mxu1 %v1985_v5  ;;  %3109 = vmatpush3.msra.mxu0 %v2079_v44  ;;  %v2181_v5 = vld [vmem:[%s5139_s12 + $0x68] sm:$0xff]  ;;  %v2170_v44 = vld [vmem:[%s5139_s12 + $0x10] sm:$0xff] }
 0x8df   :  { %3075 = vmatprep.subr.mxu1 %v5215_v36  ;;  %3110 = vmatprep.subr.mxu0 %v5215_v36 }
 0x8e0   :  { %3076 = vmatpush3.msra.mxu1 %v1984_v6  ;;  %3111 = vmatpush3.msra.mxu0 %v2078_v25  ;;  %v2180_v6 = vld [vmem:[%s5139_s12 + $0x60] sm:$0xff]  ;;  %v2169_v25 = vld [vmem:[%s5139_s12 + $0x8] sm:$0xff] }
 0x8e1   :  { %3077 = vmatprep.subr.mxu1 %v5215_v36  ;;  %3112 = vmatprep.subr.mxu0 %v5215_v36 }
 0x8e2   :  { %3078 = vmatpush3.msra.mxu1 %v1983_v7  ;;  %3113 = vmatpush3.msra.mxu0 %v2077_v46  ;;  %v2179_v7 = vld [vmem:[%s5139_s12 + $0x58] sm:$0xff]  ;;  %v2168_v46 = vld [vmem:[%s5139_s12] sm:$0xff] }
 0x8e3   :  { %3079 = vmatprep.subr.mxu1 %v5215_v36  ;;  %3114 = vmatprep.subr.mxu0 %v5215_v36 }
 0x8e4   :  { %3080 = vmatpush3.msra.mxu1 %v1982_v9  ;;  %v2178_v9 = vld [vmem:[%s5139_s12 + $0x50] sm:$0xff] }
 0x8e5   :  { %3081 = vmatprep.subr.mxu1 %v5215_v36 }
 0x8e6   :  { %3082 = vmatpush3.msra.mxu1 %v1981_v14  ;;  %v2177_v14 = vld [vmem:[%s5139_s12 + $0x48] sm:$0xff] }
 0x8e7   :  { %3083 = vmatprep.subr.mxu1 %v5215_v36 }
 0x8e8   :  { %3084 = vmatpush3.msra.mxu1 %v1980_v15  ;;  %v2176_v15 = vld [vmem:[%s5139_s12 + $0x40] sm:$0xff] }
 0x8e9   :  { %3123 = vmatprep.subr.mxu1 %v5215_v36 }
 0x988   :  { %v1882_v13 = vpop.f32.mrf.mxu1  ;;  %v1953_v11 = vpop.f32.mrf.mxu0 }
 0x989   :  { %v1883_v38 = vadd.f32 %v1882_v13, %v5266_v55  ;;  %v1954_v34 = vadd.f32 %v1953_v11, %v4121_v50  ;;  %v2277_v13 = vld [vmem:[%s5141_s14 + $0x78] sm:$0xff]  ;;  %v2276_v11 = vld [vmem:[%s5141_s14 + $0x70] sm:$0xff] }
 0x98a   :  { %v1884_v10 = vpop.f32.mrf.mxu1  ;;  %v3052_v32 = vpop.f32.mrf.mxu0 }
 0x98b   :  { %v1957_v45 = vadd.f32 %v1883_v38, %v5270_v8  ;;  %v1885_v31 = vadd.f32 %v1884_v10, %v4116_v27  ;;  %v5274_v27 = vld [vmem:[#allocation3_spill] sm:$0xff]  ;;  %v2274_v10 = vld [vmem:[%s5141_s14 + $0x60] sm:$0xff]  ;;  %v2273_v32 = vld [vmem:[%s5141_s14 + $0x58] sm:$0xff] }
 0x98c   :  { %v1000_v17 = vadd.f32 %v5274_v27, %v5273_v43  ;;  %v2275_v38 = vld [vmem:[%s5141_s14 + $0x68] sm:$0xff]  ;;  %v2272_v8 = vld [vmem:[%s5141_s14 + $0x50] sm:$0xff]  ;;  %v2387_v43 = vld [vmem:[%s5143_s13] ss:$0 sm:$0xff] }
 0x98d   :  { %v2383_v26 = vmul.f32 -1.442695, %v1957_v45  ;;  %v1964_v57 = vadd.f32 %v1885_v31, %v5271_v24  ;;  %v2271_v45 = vld [vmem:[%s5141_s14 + $0x48] sm:$0xff]  ;;  %v2269_v31 = vld [vmem:[%s5141_s14 + $0x38] sm:$0xff]  ;;  %v2268_v24 = vld [vmem:[%s5141_s14 + $0x30] sm:$0xff] }
 0x98e   :  { %v1163_v18 = vadd.f32 %v5275_v47, %v1000_v17 }
 0x98f   :  { %3265 = vpow2.f32 %v2383_v26  ;;  %v2384_v48 = vmul.f32 -1.442695, %v1964_v57  ;;  %v2270_v26 = vld [vmem:[%s5141_s14 + $0x40] sm:$0xff]  ;;  %v2267_v57 = vld [vmem:[%s5141_s14 + $0x28] sm:$0xff] }
 0x990   :  { %v1326_v51 = vadd.f32 %v5276_v19, %v1163_v18 }
 0x991   :  { %3267 = vpow2.f32 %v2384_v48  ;;  %v2266_v48 = vld [vmem:[%s5141_s14 + $0x20] sm:$0xff] }
 0x992   :  { %v1489_v20 = vadd.f32 %v4628_v2, %v1326_v51  ;;  %v2076_v2 = vld [vmem:[%s5138_s10 + $0x10] sm:$0xff] }
 0x993   :  { %3115 = vmatpush3.msra.mxu0 %v2076_v2 }
 0x994   :  { %v1652_v50 = vadd.f32 %v4756_v28, %v1489_v20  ;;  %3116 = vmatprep.subr.mxu0 %v5215_v36  ;;  %v2075_v28 = vld [vmem:[%s5138_s10 + $0x8] sm:$0xff] }
 0x995   :  { %3117 = vmatpush3.msra.mxu0 %v2075_v28 }
 0x996   :  { %v1815_v12 = vadd.f32 %v4834_v52, %v1652_v50  ;;  %3118 = vmatprep.subr.mxu0 %v5215_v36 }
 0x99c   :  { %v3266_v23 = vpop.eup %3265 }
 0x99d   :  { %v1961_v42 = vadd.f32 1.0, %v3266_v23  ;;  %v2265_v23 = vld [vmem:[%s5141_s14 + $0x18] sm:$0xff] }
 0x99e   :  { %v3268_v29 = vpop.eup %3267 }
 0x99f   :  { %3269 = vrcp.f32 %v1961_v42  ;;  %v1968_v30 = vadd.f32 1.0, %v3268_v29  ;;  %v2386_v42 = vld [vmem:[%s5142_s11] ss:$0 sm:$0xff] }
 0x9a1   :  { %3271 = vrcp.f32 %v1968_v30 }
 0x9ac   :  { %v3270_v55 = vpop.eup %3269 }
 0x9ad   :  { %v1971_v35 = vmul.f32 %v3270_v55, %v1954_v34 }
 0x9ae   :  { %v3272_v49 = vpop.eup %3271 }
 0x9af   :  { %v1972_v16 = vadd.f32 %v1971_v35, %v5272_v41  ;;  %v1974_v21 = vsub.f32 1.0, %v3272_v49  ;;  %v1976_v56 = vmul.f32 %v3272_v49, %v4834_v52  ;;  %v2074_v52 = vld [vmem:[%s5138_s10] sm:$0xff]  ;;  %v2264_v35 = vld [vmem:[%s5141_s14 + $0x10] sm:$0xff]  ;;  %v2263_v41 = vld [vmem:[%s5141_s14 + $0x8] sm:$0xff] }
 0x9b0   :  { %3119 = vmatpush3.msra.mxu0 %v2074_v52  ;;  %v2388_v49 = vld [vmem:[%s5144_s15] ss:$0 sm:$0xff] }
 0x9b1   :  { %3273 = vtanh.f32 %v1972_v16  ;;  %3158 = vmatprep.subr.mxu0 %v5215_v36  ;;  %v2262_v16 = vld [vmem:[%s5141_s14] sm:$0xff] }
 0x9be   :  { %v3274_v54 = vpop.eup %3273 }
 0x9bf   :  { %v1975_v22 = vmul.f32 %v3274_v54, %v1974_v21 }
 0x9c1   :  { %v1977_v58 = vadd.f32 %v1976_v56, %v1975_v22 }
 0x9c3   :  { %v1978_v59 = vadd.f32 %v1977_v58, %v1815_v12 }
 0x9c5   :  { %v1979_v37 = vmul.f32 0.125, %v1978_v59 }
 0x9c7   :  { %3086 = vmatmul.mubr.f32.vlgmr.msra.gmra.mxu1 %v1979_v37 }
 0x9c8   :  { %3155 = vmatprep.mubr.msk.f32.mxu1 %vm3324_vm1, %v5215_v36  ;;  %3124 = vmatpush3.msra.mxu1 %v2183_v3 }
 0x9c9   :  { %3125 = vmatprep.subr.mxu1 %v5215_v36 }
 0x9ca   :  { %3126 = vmatpush3.msra.mxu1 %v2182_v4 }
 0x9cb   :  { %3127 = vmatprep.subr.mxu1 %v5215_v36 }
 0x9cc   :  { %3128 = vmatpush3.msra.mxu1 %v2181_v5 }
 0x9cd   :  { %3129 = vmatprep.subr.mxu1 %v5215_v36 }
 0x9ce   :  { %3130 = vmatpush3.msra.mxu1 %v2180_v6 }
 0x9cf   :  { %3131 = vmatprep.subr.mxu1 %v5215_v36 }
 0x9d0   :  { %3132 = vmatpush3.msra.mxu1 %v2179_v7 }
 0x9d1   :  { %3133 = vmatprep.subr.mxu1 %v5215_v36 }
 0x9d2   :  { %3134 = vmatpush3.msra.mxu1 %v2178_v9 }
 0x9d3   :  { %3135 = vmatprep.subr.mxu1 %v5215_v36 }
 0x9d4   :  { %3136 = vmatpush3.msra.mxu1 %v2177_v14 }
 0x9d5   :  { %3137 = vmatprep.subr.mxu1 %v5215_v36 }
 0x9d6   :  { %3138 = vmatpush3.msra.mxu1 %v2176_v15 }
 0x9d7   :  { %3139 = vmatprep.subr.mxu1 %v5215_v36 }
 0x9d8   :  { %3140 = vmatpush3.msra.mxu1 %v2175_v33 }
 0x9d9   :  { %3141 = vmatprep.subr.mxu1 %v5215_v36 }
 0x9da   :  { %3142 = vmatpush3.msra.mxu1 %v2174_v40 }
 0x9db   :  { %3143 = vmatprep.subr.mxu1 %v5215_v36 }
 0x9dc   :  { %3144 = vmatpush3.msra.mxu1 %v2173_v53 }
 0x9dd   :  { %3145 = vmatprep.subr.mxu1 %v5215_v36 }
 0x9de   :  { %3146 = vmatpush3.msra.mxu1 %v2172_v61 }
 0x9df   :  { %3147 = vmatprep.subr.mxu1 %v5215_v36 }
 0x9e0   :  { %3148 = vmatpush3.msra.mxu1 %v2171_v60 }
 0x9e1   :  { %3149 = vmatprep.subr.mxu1 %v5215_v36 }
 0x9e2   :  { %3150 = vmatpush3.msra.mxu1 %v2170_v44 }
 0x9e3   :  { %3151 = vmatprep.subr.mxu1 %v5215_v36 }
 0x9e4   :  { %3152 = vmatpush3.msra.mxu1 %v2169_v25 }
 0x9e5   :  { %3153 = vmatprep.subr.mxu1 %v5215_v36 }
 0x9e6   :  { %3154 = vmatpush3.msra.mxu1 %v2168_v46 }
 0xa87   :  { %v2069_v62 = vpop.f32.mrf.mxu1 }
 0xa88   :  { %v2070_v0 = vadd.f32 %v2385_v63, %v2069_v62 }
 0xa89   :  { %v3087_v1 = vpop.f32.mrf.mxu1 }
 0xa8a   :  { %v2073_v39 = vmax.f32 %v2070_v0, 0.0 }
 0xa8c   :  { %3121 = vmatmul.mubr.f32.vlgmr.msra.gmra.mxu0 %v2073_v39 }
 0xa8d   :  { %3190 = vmatprep.mubr.msk.f32.mxu0 %vm3324_vm1, %v5215_v36  ;;  %3159 = vmatpush3.msra.mxu0 %v2277_v13 }
 0xa8e   :  { %3160 = vmatprep.subr.mxu0 %v5215_v36 }
 0xa8f   :  { %3161 = vmatpush3.msra.mxu0 %v2276_v11 }
 0xa90   :  { %3162 = vmatprep.subr.mxu0 %v5215_v36 }
 0xa91   :  { %3163 = vmatpush3.msra.mxu0 %v2275_v38 }
 0xa92   :  { %3164 = vmatprep.subr.mxu0 %v5215_v36 }
 0xa93   :  { %3165 = vmatpush3.msra.mxu0 %v2274_v10 }
 0xa94   :  { %3166 = vmatprep.subr.mxu0 %v5215_v36 }
 0xa95   :  { %3167 = vmatpush3.msra.mxu0 %v2273_v32 }
 0xa96   :  { %3168 = vmatprep.subr.mxu0 %v5215_v36 }
 0xa97   :  { %3169 = vmatpush3.msra.mxu0 %v2272_v8 }
 0xa98   :  { %3170 = vmatprep.subr.mxu0 %v5215_v36 }
 0xa99   :  { %3171 = vmatpush3.msra.mxu0 %v2271_v45 }
 0xa9a   :  { %3172 = vmatprep.subr.mxu0 %v5215_v36 }
 0xa9b   :  { %3173 = vmatpush3.msra.mxu0 %v2270_v26 }
 0xa9c   :  { %3174 = vmatprep.subr.mxu0 %v5215_v36 }
 0xa9d   :  { %3175 = vmatpush3.msra.mxu0 %v2269_v31 }
 0xa9e   :  { %3176 = vmatprep.subr.mxu0 %v5215_v36 }
 0xa9f   :  { %3177 = vmatpush3.msra.mxu0 %v2268_v24 }
 0xaa0   :  { %3178 = vmatprep.subr.mxu0 %v5215_v36 }
 0xaa1   :  { %3179 = vmatpush3.msra.mxu0 %v2267_v57 }
 0xaa2   :  { %3180 = vmatprep.subr.mxu0 %v5215_v36 }
 0xaa3   :  { %3181 = vmatpush3.msra.mxu0 %v2266_v48 }
 0xaa4   :  { %3182 = vmatprep.subr.mxu0 %v5215_v36 }
 0xaa5   :  { %3183 = vmatpush3.msra.mxu0 %v2265_v23 }
 0xaa6   :  { %3184 = vmatprep.subr.mxu0 %v5215_v36 }
 0xaa7   :  { %3185 = vmatpush3.msra.mxu0 %v2264_v35 }
 0xaa8   :  { %3186 = vmatprep.subr.mxu0 %v5215_v36 }
 0xaa9   :  { %3187 = vmatpush3.msra.mxu0 %v2263_v41 }
 0xaaa   :  { %3188 = vmatprep.subr.mxu0 %v5215_v36 }
 0xaab   :  { %3189 = vmatpush3.msra.mxu0 %v2262_v16 }
 0xb4c   :  { %v2163_v29 = vpop.f32.mrf.mxu0 }
 0xb4d   :  { %v2164_v30 = vadd.f32 %v2386_v42, %v2163_v29 }
 0xb4e   :  { %v3122_v34 = vpop.f32.mrf.mxu0 }
 0xb4f   :  { %v2167_v55 = vmax.f32 %v2164_v30, 0.0 }
 0xb51   :  { %3156 = vmatmul.mubr.f32.vlgmr.msra.gmra.mxu1 %v2167_v55 }
 0xc11   :  { %v2257_v27 = vpop.f32.mrf.mxu1 }
 0xc12   :  { %v2258_v17 = vadd.f32 %v2387_v43, %v2257_v27 }
 0xc13   :  { %v3157_v47 = vpop.f32.mrf.mxu1 }
 0xc14   :  { %v2261_v18 = vmax.f32 %v2258_v17, 0.0 }
 0xc16   :  { %3191 = vmatmul.mubr.f32.vlgmr.msra.gmra.mxu0 %v2261_v18 }
 0xcd6   :  { %v2351_v19 = vpop.f32.mrf.mxu0 }
 0xcd7   :  { %v2352_v51 = vadd.f32 %v2388_v49, %v2351_v19 }
 0xcd8   :  { %v3192_v20 = vpop.f32.mrf.mxu0 }
 0xcd9   :  { %2355 = vst [vmem:[%s5145_s16] sm:$0xff] %v2352_v51 }

</bundles_post_ra>
